<compile_context>
chip_gen: v7x
topology: tpu7x:2x2x1
jax: 0.10.0
libtpu: 0.0.40
codegen_flags: <defaults>
</compile_context>

<pallas_src>
import functools
import math

import jax
import jax.numpy as jnp
from jax.experimental import pallas as pl
from jax.experimental.pallas import tpu as pltpu

LRELU_SLOPE = 0.2
IN_EPS = 1e-8
BLUR_C0, BLUR_C1 = 0.25, 0.5       # separable [1,2,1]/4 per axis -> outer()/16 total
_BLUR_1D = (1.0, 2.0, 1.0)


# ------------------------------ Pallas kernels --------------------------------


def _conv_taps(xp_ref, w_ref, Wp, Mo):
    """3x3 conv as 9 shifted-lane-slice matmuls (bf16 x bf16 -> f32 accumulate)."""
    acc = jnp.dot(w_ref[0], xp_ref[0, :, 0:Mo], preferred_element_type=jnp.float32)
    for t in range(1, 9):
        dy, dx = divmod(t, 3)
        off = dy * Wp + dx
        acc = acc + jnp.dot(w_ref[t], xp_ref[0, :, off:off + Mo],
                            preferred_element_type=jnp.float32)
    return acc


def _epilogue(y, nw_ref, ns_ref, ys_ref, yb_ref, cmask, n_valid):
    """noise -> LeakyReLU -> InstanceNorm (masked lane reduction) -> StyleMod."""
    y = y + nw_ref[...] * ns_ref[0]                       # (Ct,1)*(1,Mo) noise add
    y = jnp.where(y >= 0.0, y, LRELU_SLOPE * y)
    ym = y * cmask                                        # ignore the halo columns
    inv_n = 1.0 / float(n_valid)
    s1 = jnp.sum(ym, axis=1, keepdims=True)
    s2 = jnp.sum(ym * ym, axis=1, keepdims=True)
    mu = s1 * inv_n
    var = s2 * inv_n - mu * mu
    xn = (y - mu) * jax.lax.rsqrt(var + IN_EPS)
    return xn * (ys_ref[0] + 1.0) + yb_ref[0]


def _conv0_blur_epi_kernel(xp_ref, w_ref, b_ref, nw_ref, ns_ref, ys_ref, yb_ref,
                           cm_ref, o_ref, blur_ref, *, Wp, Mo, n_valid):
    # xp: (1,Cin,L1) bf16 | w: (9,Ct,Cin) bf16 | b/nw: (Ct,1) f32 | ns: (1,1,Mo) f32
    # ys/yb: (1,Ct,1) f32 | cm: (1,Mo) f32 | o: (1,Ct,L2) bf16 | blur scratch (Ct,L2)
    f32 = jnp.float32
    cmask = cm_ref[...]
    acc = _conv_taps(xp_ref, w_ref, Wp, Mo)
    y = acc * cmask                       # zero halo columns: they are the blur halo
    ct = y.shape[0]
    pad = Wp + 1
    Ls = Mo + 2 * pad
    # separable blur with explicit zero halo, built in a VMEM scratch
    zpad = jnp.zeros((ct, pad), f32)
    blur_ref[:, 0:pad] = zpad
    blur_ref[:, pad:pad + Mo] = y
    blur_ref[:, pad + Mo:Ls] = zpad
    s = blur_ref[...]                                     # (Ct, Ls)
    th = (BLUR_C0 * s[:, 0:Ls - 2] + BLUR_C1 * s[:, 1:Ls - 1]
          + BLUR_C0 * s[:, 2:Ls])                         # horizontal pass
    y = (BLUR_C0 * th[:, 0:Mo] + BLUR_C1 * th[:, Wp:Wp + Mo]
         + BLUR_C0 * th[:, 2 * Wp:2 * Wp + Mo])           # vertical pass
    y = y + b_ref[...]                                    # conv bias (after blur)
    out = _epilogue(y, nw_ref, ns_ref, ys_ref, yb_ref, cmask, n_valid)
    out = out * cmask                     # re-zero halo cols: they pad the next conv
    # store embedded in a zero-halo row layout (leading/trailing zero bands)
    zb = jnp.zeros((ct, pad), o_ref.dtype)
    o_ref[0, :, 0:pad] = zb
    o_ref[0, :, pad:pad + Mo] = out.astype(o_ref.dtype)
    o_ref[0, :, pad + Mo:pad + Mo + pad] = zb


def _conv1_epi_kernel(xp_ref, w_ref, b_ref, nw_ref, ns_ref, ys_ref, yb_ref,
                      cm_ref, o_ref, *, Wp, Mo, n_valid):
    cmask = cm_ref[...]
    acc = _conv_taps(xp_ref, w_ref, Wp, Mo)
    y = acc + b_ref[...]
    o_ref[0] = _epilogue(y, nw_ref, ns_ref, ys_ref, yb_ref, cmask, n_valid)


def _fused_layer(kernel, x_flat, w_taps, bias_c, nw_c, noise_f, ys, yb, colmask, *,
                 Wp, Mo, L_out, out_dtype, n_valid, ct, scratch_shapes=()):
    N, Cin, L_in = x_flat.shape
    Cout = w_taps.shape[1]
    grid = (N, Cout // ct)
    kfn = functools.partial(kernel, Wp=Wp, Mo=Mo, n_valid=n_valid)
    return pl.pallas_call(
        kfn,
        out_shape=jax.ShapeDtypeStruct((N, Cout, L_out), out_dtype),
        grid_spec=pltpu.PrefetchScalarGridSpec(
            num_scalar_prefetch=0,
            grid=grid,
            in_specs=[
                pl.BlockSpec((1, Cin, L_in), lambda n, j: (n, 0, 0)),   # activations
                pl.BlockSpec((9, ct, Cin), lambda n, j: (0, j, 0)),     # conv taps
                pl.BlockSpec((ct, 1), lambda n, j: (j, 0)),             # bias
                pl.BlockSpec((ct, 1), lambda n, j: (j, 0)),             # noise weight
                pl.BlockSpec((1, 1, Mo), lambda n, j: (n, 0, 0)),       # noise map
                pl.BlockSpec((1, ct, 1), lambda n, j: (n, j, 0)),       # style scale
                pl.BlockSpec((1, ct, 1), lambda n, j: (n, j, 0)),       # style bias
                pl.BlockSpec((1, Mo), lambda n, j: (0, 0)),             # column mask
            ],
            out_specs=pl.BlockSpec((1, ct, L_out), lambda n, j: (n, j, 0)),
            scratch_shapes=list(scratch_shapes),
        ),
        compiler_params=pltpu.CompilerParams(
            dimension_semantics=("parallel", "parallel"),
            vmem_limit_bytes=32 * 1024 * 1024,
        ),
    )(x_flat, w_taps, bias_c, nw_c, noise_f, ys, yb, colmask)


# -------------------------------- forward -------------------------------------


def synthesis_block_forward(x_nchw, dlatents, params, *, channel_tile=128):
    """x: [N, Cin, H, W], dlatents: [N, 2, dlatent] -> [N, Cout, 2H, 2W] (NCHW)."""
    N, Cin, H, W = x_nchw.shape
    Cout = params["b0"].shape[0]
    H2, W2 = 2 * H, 2 * W
    Wp = W2 + 2                      # padded row width (2 halo columns per row)
    Mo = H2 * Wp                     # flattened output length per image
    pad = Wp + 1                     # data offset inside a halo'd flat buffer
    L1 = (H2 + 3) * Wp               # conv0 input length (1 top + 2 bottom halo rows)
    L2 = Mo + 2 * pad                # intermediate length (halo'd for conv1)
    n_valid = H2 * W2
    ct = Cout if Cout <= channel_tile else channel_tile
    assert Cout % ct == 0, (Cout, ct)
    f32, bf16 = jnp.float32, jnp.bfloat16

    # ---- lightweight XLA prep (single pass; no im2col / tap stacks) -----------
    # TODO(synk): fold the nearest-2x upsample into kernel 1 (transposed-conv phase
    # decomposition) so the 4x-upsampled input never touches HBM.
    x_up = jnp.repeat(jnp.repeat(x_nchw.astype(bf16), 2, axis=2), 2, axis=3)
    x_pad = jnp.pad(x_up, ((0, 0), (0, 0), (1, 2), (1, 1)))
    x_flat = x_pad.reshape(N, Cin, L1)

    # conv weights -> tap-major [9, Cout, Cin], bf16 (MXU native)
    w0t = jnp.transpose(params["w0"], (2, 3, 0, 1)).reshape(9, Cout, Cin).astype(bf16)
    w1t = jnp.transpose(params["w1"], (2, 3, 0, 1)).reshape(9, Cout, Cout).astype(bf16)

    # per-channel vectors as column vectors (channels on sublanes, no in-kernel relayout)
    b0c = params["b0"].reshape(Cout, 1).astype(f32)
    b1c = params["b1"].reshape(Cout, 1).astype(f32)
    nw1c = params["nw1"].reshape(Cout, 1).astype(f32)
    nw2c = params["nw2"].reshape(Cout, 1).astype(f32)

    # style affine (tiny matmul, done once in XLA) -> per-channel scale / bias
    s1 = dlatents[:, 0] @ params["ws1"] + params["bs1"]
    s2 = dlatents[:, 1] @ params["ws2"] + params["bs2"]
    ys1 = s1[:, :Cout].reshape(N, Cout, 1)
    yb1 = s1[:, Cout:].reshape(N, Cout, 1)
    ys2 = s2[:, :Cout].reshape(N, Cout, 1)
    yb2 = s2[:, Cout:].reshape(N, Cout, 1)

    # per-pixel noise maps in the halo'd flat row layout [N, 1, Mo]
    n1 = jnp.pad(params["noise1"].reshape(N, H2, W2), ((0, 0), (0, 0), (0, Wp - W2)))
    n2 = jnp.pad(params["noise2"].reshape(N, H2, W2), ((0, 0), (0, 0), (0, Wp - W2)))
    n1 = n1.reshape(N, 1, Mo).astype(f32)
    n2 = n2.reshape(N, 1, Mo).astype(f32)

    # valid-column mask: zero on the 2 halo columns of every flattened row
    colmask = ((jnp.arange(Mo) % Wp) < W2).astype(f32).reshape(1, Mo)

    # ---- layer 0: upsampled conv3x3 + blur + bias + noise/LReLU/IN/Style ------
    y1 = _fused_layer(
        _conv0_blur_epi_kernel, x_flat, w0t, b0c, nw1c, n1, ys1, yb1, colmask,
        Wp=Wp, Mo=Mo, L_out=L2, out_dtype=bf16, n_valid=n_valid, ct=ct,
        scratch_shapes=[pltpu.VMEM((ct, L2), jnp.float32)])

    # ---- layer 1: conv3x3 + bias + noise/LReLU/IN/Style -----------------------
    y2 = _fused_layer(
        _conv1_epi_kernel, y1, w1t, b1c, nw2c, n2, ys2, yb2, colmask,
        Wp=Wp, Mo=Mo, L_out=Mo, out_dtype=f32, n_valid=n_valid, ct=ct)

    # drop the per-row halo columns -> NCHW output, matching the PyTorch module
    return y2.reshape(N, Cout, H2, Wp)[:, :, :, :W2]


# --------------------------- deterministic init --------------------------------


def init_params(key, in_channels, out_channels, dlatent_size, N, H2, W2,
                gain=math.sqrt(2.0)):
    # use_wscale=True: effective conv weight = randn * he_std, he_std = gain/sqrt(fan_in)
    he0 = gain / math.sqrt(in_channels * 9)
    he1 = gain / math.sqrt(out_channels * 9)
    hes = 1.0 / math.sqrt(dlatent_size)      # StyleMod linear uses gain=1.0
    ks = jax.random.split(key, 12)
    f32 = jnp.float32
    # TODO(synk): NoiseLayer draws torch.randn at every forward; fixed deterministic
    # noise inputs are used here so the kernel is reproducible.
    return dict(
        w0=jax.random.normal(ks[0], (out_channels, in_channels, 3, 3), f32) * he0,
        b0=jax.random.normal(ks[1], (out_channels,), f32) * 0.1,
        w1=jax.random.normal(ks[2], (out_channels, out_channels, 3, 3), f32) * he1,
        b1=jax.random.normal(ks[3], (out_channels,), f32) * 0.1,
        ws1=jax.random.normal(ks[4], (dlatent_size, 2 * out_channels), f32) * hes,
        bs1=jax.random.normal(ks[5], (2 * out_channels,), f32) * 0.1,
        ws2=jax.random.normal(ks[6], (dlatent_size, 2 * out_channels), f32) * hes,
        bs2=jax.random.normal(ks[7], (2 * out_channels,), f32) * 0.1,
        nw1=jax.random.normal(ks[8], (out_channels,), f32) * 0.1,
        nw2=jax.random.normal(ks[9], (out_channels,), f32) * 0.1,
        noise1=jax.random.normal(ks[10], (N, 1, H2, W2), f32),
        noise2=jax.random.normal(ks[11], (N, 1, H2, W2), f32),
    )


# --------------------------- pure-JAX reference ---------------------------------


def reference_forward(x_nchw, dlatents, params):
    def conv3x3(x, w):
        return jax.lax.conv_general_dilated(
            x, w, (1, 1), ((1, 1), (1, 1)),
            dimension_numbers=("NCHW", "OIHW", "NCHW"))

    def blur(x):
        k = jnp.array(_BLUR_1D, jnp.float32)
        k2 = k[:, None] * k[None, :]
        k2 = k2 / k2.sum()
        C = x.shape[1]
        kern = jnp.tile(k2[None, None], (C, 1, 1, 1))
        return jax.lax.conv_general_dilated(
            x, kern, (1, 1), ((1, 1), (1, 1)),
            dimension_numbers=("NCHW", "OIHW", "NCHW"),
            feature_group_count=C)

    def epi(x, dlat, nw, noise, ws, bs):
        x = x + nw[None, :, None, None] * noise
        x = jnp.where(x >= 0.0, x, LRELU_SLOPE * x)
        mu = jnp.mean(x, axis=(2, 3), keepdims=True)
        xc = x - mu
        var = jnp.mean(xc * xc, axis=(2, 3), keepdims=True)
        x = xc * jax.lax.rsqrt(var + IN_EPS)
        style = dlat @ ws + bs
        C = x.shape[1]
        ys = style[:, :C][:, :, None, None]
        yb = style[:, C:][:, :, None, None]
        return x * (ys + 1.0) + yb

    x = jnp.repeat(jnp.repeat(x_nchw, 2, axis=2), 2, axis=3)
    x = blur(conv3x3(x, params["w0"])) + params["b0"][None, :, None, None]
    x = epi(x, dlatents[:, 0], params["nw1"], params["noise1"], params["ws1"], params["bs1"])
    x = conv3x3(x, params["w1"]) + params["b1"][None, :, None, None]
    x = epi(x, dlatents[:, 1], params["nw2"], params["noise2"], params["ws2"], params["bs2"])
    return x


if __name__ == "__main__":
    N, Cin, Cout, H, W, D = 2, 8, 16, 8, 8, 16
    key = jax.random.PRNGKey(0)
    k_x, k_w, k_p = jax.random.split(key, 3)
    x = jax.random.normal(k_x, (N, Cin, H, W), jnp.float32)        # NCHW
    dlatents = jax.random.normal(k_w, (N, 2, D), jnp.float32)      # [N, 2, dlatent]
    params = init_params(k_p, Cin, Cout, D, N, 2 * H, 2 * W)

    fwd = jax.jit(synthesis_block_forward)
    out = jax.block_until_ready(fwd(x, dlatents, params))
    assert out.shape == (N, Cout, 2 * H, 2 * W), out.shape
    assert out.dtype == jnp.float32, out.dtype

    ref = jax.block_until_ready(reference_forward(x, dlatents, params))
    max_err = float(jnp.max(jnp.abs(out - ref)))
    scale = float(jnp.max(jnp.abs(ref)))
    # bf16 MXU operands (conv activations / weights / layer-1 intermediate) bound
    # the achievable accuracy vs. the all-f32 reference.
    assert max_err <= 3e-2 * (1.0 + scale), (max_err, scale)

    print("KERNEL_OK")
</pallas_src>

<mosaic_0001>
module attributes {stable_mosaic.version = 11 : i64} {
  func.func @_conv0_blur_epi_kernel(%arg0: i32, %arg1: i32, %arg2: memref<1x8x342xbf16, #tpu.memory_space<vmem>>, %arg3: memref<9x16x8xbf16, #tpu.memory_space<vmem>>, %arg4: memref<16x1xf32, #tpu.memory_space<vmem>>, %arg5: memref<16x1xf32, #tpu.memory_space<vmem>>, %arg6: memref<1x1x288xf32, #tpu.memory_space<vmem>>, %arg7: memref<1x16x1xf32, #tpu.memory_space<vmem>>, %arg8: memref<1x16x1xf32, #tpu.memory_space<vmem>>, %arg9: memref<1x288xf32, #tpu.memory_space<vmem>>, %arg10: memref<1x16x326xbf16, #tpu.memory_space<vmem>>, %arg11: memref<16x326xf32, #tpu.memory_space<vmem>>) attributes {dimension_semantics = [#tpu.dimension_semantics<parallel>, #tpu.dimension_semantics<parallel>], iteration_bounds = array<i64: 2, 1>, scalar_prefetch = 0 : i64, scratch_operands = 1 : i64, tpu.core_type = #tpu.core_type<tc>, window_params = [{transform_indices = @transform_0, window_bounds = array<i64: 1, 8, 342>}, {transform_indices = @transform_1, window_bounds = array<i64: 9, 16, 8>}, {transform_indices = @transform_2, window_bounds = array<i64: 16, 1>}, {transform_indices = @transform_3, window_bounds = array<i64: 16, 1>}, {transform_indices = @transform_4, window_bounds = array<i64: 1, 1, 288>}, {transform_indices = @transform_5, window_bounds = array<i64: 1, 16, 1>}, {transform_indices = @transform_6, window_bounds = array<i64: 1, 16, 1>}, {pipeline_mode = #tpu.pipeline_mode<synchronous>, transform_indices = @transform_7, window_bounds = array<i64: 1, 288>}, {transform_indices = @transform_8, window_bounds = array<i64: 1, 16, 326>}]} {
    %c0 = arith.constant 0 : index
    %c0_0 = arith.constant 0 : index
    %0 = vector.load %arg9[%c0, %c0_0] : memref<1x288xf32, #tpu.memory_space<vmem>>, vector<1x288xf32>
    %c0_1 = arith.constant 0 : index
    %c0_2 = arith.constant 0 : index
    %c0_3 = arith.constant 0 : index
    %1 = vector.load %arg3[%c0_1, %c0_2, %c0_3] : memref<9x16x8xbf16, #tpu.memory_space<vmem>>, vector<1x16x8xbf16>
    %2 = vector.shape_cast %1 : vector<1x16x8xbf16> to vector<16x8xbf16>
    %c0_4 = arith.constant 0 : index
    %c0_5 = arith.constant 0 : index
    %c0_6 = arith.constant 0 : index
    %3 = vector.load %arg2[%c0_4, %c0_5, %c0_6] : memref<1x8x342xbf16, #tpu.memory_space<vmem>>, vector<1x8x288xbf16>
    %4 = vector.shape_cast %3 : vector<1x8x288xbf16> to vector<8x288xbf16>
    %cst = arith.constant dense<0.000000e+00> : vector<16x288xf32>
    %5 = tpu.matmul %2, %4, %cst {dimension_numbers = #tpu.dot_dimension_numbers<[1], [0], [0], [1], [0, 0, 1, 1], [], []>} : vector<16x8xbf16>, vector<8x288xbf16>, vector<16x288xf32> -> vector<16x288xf32>
    %c1 = arith.constant 1 : index
    %c0_7 = arith.constant 0 : index
    %c0_8 = arith.constant 0 : index
    %6 = vector.load %arg3[%c1, %c0_7, %c0_8] : memref<9x16x8xbf16, #tpu.memory_space<vmem>>, vector<1x16x8xbf16>
    %7 = vector.shape_cast %6 : vector<1x16x8xbf16> to vector<16x8xbf16>
    %c0_9 = arith.constant 0 : index
    %c0_10 = arith.constant 0 : index
    %c1_11 = arith.constant 1 : index
    %8 = vector.load %arg2[%c0_9, %c0_10, %c1_11] : memref<1x8x342xbf16, #tpu.memory_space<vmem>>, vector<1x8x288xbf16>
    %9 = vector.shape_cast %8 : vector<1x8x288xbf16> to vector<8x288xbf16>
    %cst_12 = arith.constant dense<0.000000e+00> : vector<16x288xf32>
    %10 = tpu.matmul %7, %9, %cst_12 {dimension_numbers = #tpu.dot_dimension_numbers<[1], [0], [0], [1], [0, 0, 1, 1], [], []>} : vector<16x8xbf16>, vector<8x288xbf16>, vector<16x288xf32> -> vector<16x288xf32>
    %11 = arith.addf %5, %10 : vector<16x288xf32>
    %c2 = arith.constant 2 : index
    %c0_13 = arith.constant 0 : index
    %c0_14 = arith.constant 0 : index
    %12 = vector.load %arg3[%c2, %c0_13, %c0_14] : memref<9x16x8xbf16, #tpu.memory_space<vmem>>, vector<1x16x8xbf16>
    %13 = vector.shape_cast %12 : vector<1x16x8xbf16> to vector<16x8xbf16>
    %c0_15 = arith.constant 0 : index
    %c0_16 = arith.constant 0 : index
    %c2_17 = arith.constant 2 : index
    %14 = vector.load %arg2[%c0_15, %c0_16, %c2_17] : memref<1x8x342xbf16, #tpu.memory_space<vmem>>, vector<1x8x288xbf16>
    %15 = vector.shape_cast %14 : vector<1x8x288xbf16> to vector<8x288xbf16>
    %cst_18 = arith.constant dense<0.000000e+00> : vector<16x288xf32>
    %16 = tpu.matmul %13, %15, %cst_18 {dimension_numbers = #tpu.dot_dimension_numbers<[1], [0], [0], [1], [0, 0, 1, 1], [], []>} : vector<16x8xbf16>, vector<8x288xbf16>, vector<16x288xf32> -> vector<16x288xf32>
    %17 = arith.addf %11, %16 : vector<16x288xf32>
    %c3 = arith.constant 3 : index
    %c0_19 = arith.constant 0 : index
    %c0_20 = arith.constant 0 : index
    %18 = vector.load %arg3[%c3, %c0_19, %c0_20] : memref<9x16x8xbf16, #tpu.memory_space<vmem>>, vector<1x16x8xbf16>
    %19 = vector.shape_cast %18 : vector<1x16x8xbf16> to vector<16x8xbf16>
    %c0_21 = arith.constant 0 : index
    %c0_22 = arith.constant 0 : index
    %c18 = arith.constant 18 : index
    %20 = vector.load %arg2[%c0_21, %c0_22, %c18] : memref<1x8x342xbf16, #tpu.memory_space<vmem>>, vector<1x8x288xbf16>
    %21 = vector.shape_cast %20 : vector<1x8x288xbf16> to vector<8x288xbf16>
    %cst_23 = arith.constant dense<0.000000e+00> : vector<16x288xf32>
    %22 = tpu.matmul %19, %21, %cst_23 {dimension_numbers = #tpu.dot_dimension_numbers<[1], [0], [0], [1], [0, 0, 1, 1], [], []>} : vector<16x8xbf16>, vector<8x288xbf16>, vector<16x288xf32> -> vector<16x288xf32>
    %23 = arith.addf %17, %22 : vector<16x288xf32>
    %c4 = arith.constant 4 : index
    %c0_24 = arith.constant 0 : index
    %c0_25 = arith.constant 0 : index
    %24 = vector.load %arg3[%c4, %c0_24, %c0_25] : memref<9x16x8xbf16, #tpu.memory_space<vmem>>, vector<1x16x8xbf16>
    %25 = vector.shape_cast %24 : vector<1x16x8xbf16> to vector<16x8xbf16>
    %c0_26 = arith.constant 0 : index
    %c0_27 = arith.constant 0 : index
    %c19 = arith.constant 19 : index
    %26 = vector.load %arg2[%c0_26, %c0_27, %c19] : memref<1x8x342xbf16, #tpu.memory_space<vmem>>, vector<1x8x288xbf16>
    %27 = vector.shape_cast %26 : vector<1x8x288xbf16> to vector<8x288xbf16>
    %cst_28 = arith.constant dense<0.000000e+00> : vector<16x288xf32>
    %28 = tpu.matmul %25, %27, %cst_28 {dimension_numbers = #tpu.dot_dimension_numbers<[1], [0], [0], [1], [0, 0, 1, 1], [], []>} : vector<16x8xbf16>, vector<8x288xbf16>, vector<16x288xf32> -> vector<16x288xf32>
    %29 = arith.addf %23, %28 : vector<16x288xf32>
    %c5 = arith.constant 5 : index
    %c0_29 = arith.constant 0 : index
    %c0_30 = arith.constant 0 : index
    %30 = vector.load %arg3[%c5, %c0_29, %c0_30] : memref<9x16x8xbf16, #tpu.memory_space<vmem>>, vector<1x16x8xbf16>
    %31 = vector.shape_cast %30 : vector<1x16x8xbf16> to vector<16x8xbf16>
    %c0_31 = arith.constant 0 : index
    %c0_32 = arith.constant 0 : index
    %c20 = arith.constant 20 : index
    %32 = vector.load %arg2[%c0_31, %c0_32, %c20] : memref<1x8x342xbf16, #tpu.memory_space<vmem>>, vector<1x8x288xbf16>
    %33 = vector.shape_cast %32 : vector<1x8x288xbf16> to vector<8x288xbf16>
    %cst_33 = arith.constant dense<0.000000e+00> : vector<16x288xf32>
    %34 = tpu.matmul %31, %33, %cst_33 {dimension_numbers = #tpu.dot_dimension_numbers<[1], [0], [0], [1], [0, 0, 1, 1], [], []>} : vector<16x8xbf16>, vector<8x288xbf16>, vector<16x288xf32> -> vector<16x288xf32>
    %35 = arith.addf %29, %34 : vector<16x288xf32>
    %c6 = arith.constant 6 : index
    %c0_34 = arith.constant 0 : index
    %c0_35 = arith.constant 0 : index
    %36 = vector.load %arg3[%c6, %c0_34, %c0_35] : memref<9x16x8xbf16, #tpu.memory_space<vmem>>, vector<1x16x8xbf16>
    %37 = vector.shape_cast %36 : vector<1x16x8xbf16> to vector<16x8xbf16>
    %c0_36 = arith.constant 0 : index
    %c0_37 = arith.constant 0 : index
    %c36 = arith.constant 36 : index
    %38 = vector.load %arg2[%c0_36, %c0_37, %c36] : memref<1x8x342xbf16, #tpu.memory_space<vmem>>, vector<1x8x288xbf16>
    %39 = vector.shape_cast %38 : vector<1x8x288xbf16> to vector<8x288xbf16>
    %cst_38 = arith.constant dense<0.000000e+00> : vector<16x288xf32>
    %40 = tpu.matmul %37, %39, %cst_38 {dimension_numbers = #tpu.dot_dimension_numbers<[1], [0], [0], [1], [0, 0, 1, 1], [], []>} : vector<16x8xbf16>, vector<8x288xbf16>, vector<16x288xf32> -> vector<16x288xf32>
    %41 = arith.addf %35, %40 : vector<16x288xf32>
    %c7 = arith.constant 7 : index
    %c0_39 = arith.constant 0 : index
    %c0_40 = arith.constant 0 : index
    %42 = vector.load %arg3[%c7, %c0_39, %c0_40] : memref<9x16x8xbf16, #tpu.memory_space<vmem>>, vector<1x16x8xbf16>
    %43 = vector.shape_cast %42 : vector<1x16x8xbf16> to vector<16x8xbf16>
    %c0_41 = arith.constant 0 : index
    %c0_42 = arith.constant 0 : index
    %c37 = arith.constant 37 : index
    %44 = vector.load %arg2[%c0_41, %c0_42, %c37] : memref<1x8x342xbf16, #tpu.memory_space<vmem>>, vector<1x8x288xbf16>
    %45 = vector.shape_cast %44 : vector<1x8x288xbf16> to vector<8x288xbf16>
    %cst_43 = arith.constant dense<0.000000e+00> : vector<16x288xf32>
    %46 = tpu.matmul %43, %45, %cst_43 {dimension_numbers = #tpu.dot_dimension_numbers<[1], [0], [0], [1], [0, 0, 1, 1], [], []>} : vector<16x8xbf16>, vector<8x288xbf16>, vector<16x288xf32> -> vector<16x288xf32>
    %47 = arith.addf %41, %46 : vector<16x288xf32>
    %c8 = arith.constant 8 : index
    %c0_44 = arith.constant 0 : index
    %c0_45 = arith.constant 0 : index
    %48 = vector.load %arg3[%c8, %c0_44, %c0_45] : memref<9x16x8xbf16, #tpu.memory_space<vmem>>, vector<1x16x8xbf16>
    %49 = vector.shape_cast %48 : vector<1x16x8xbf16> to vector<16x8xbf16>
    %c0_46 = arith.constant 0 : index
    %c0_47 = arith.constant 0 : index
    %c38 = arith.constant 38 : index
    %50 = vector.load %arg2[%c0_46, %c0_47, %c38] : memref<1x8x342xbf16, #tpu.memory_space<vmem>>, vector<1x8x288xbf16>
    %51 = vector.shape_cast %50 : vector<1x8x288xbf16> to vector<8x288xbf16>
    %cst_48 = arith.constant dense<0.000000e+00> : vector<16x288xf32>
    %52 = tpu.matmul %49, %51, %cst_48 {dimension_numbers = #tpu.dot_dimension_numbers<[1], [0], [0], [1], [0, 0, 1, 1], [], []>} : vector<16x8xbf16>, vector<8x288xbf16>, vector<16x288xf32> -> vector<16x288xf32>
    %53 = arith.addf %47, %52 : vector<16x288xf32>
    %54 = vector.broadcast %0 : vector<1x288xf32> to vector<16x288xf32>
    %55 = arith.mulf %53, %54 : vector<16x288xf32>
    %cst_49 = arith.constant 0.000000e+00 : f32
    %56 = vector.broadcast %cst_49 : f32 to vector<16x19xf32>
    %c0_50 = arith.constant 0 : index
    %c0_51 = arith.constant 0 : index
    %57 = vector.load %arg11[%c0_50, %c0_51] : memref<16x326xf32, #tpu.memory_space<vmem>>, vector<16x19xf32>
    tpu.vector_store %arg11[%c0_50, %c0_51], %56 {strides = array<i32>} : memref<16x326xf32, #tpu.memory_space<vmem>>, vector<16x19xf32>,
    %c0_52 = arith.constant 0 : index
    %c19_53 = arith.constant 19 : index
    %58 = vector.load %arg11[%c0_52, %c19_53] : memref<16x326xf32, #tpu.memory_space<vmem>>, vector<16x288xf32>
    tpu.vector_store %arg11[%c0_52, %c19_53], %55 {strides = array<i32>} : memref<16x326xf32, #tpu.memory_space<vmem>>, vector<16x288xf32>,
    %c0_54 = arith.constant 0 : index
    %c307 = arith.constant 307 : index
    %59 = vector.load %arg11[%c0_54, %c307] : memref<16x326xf32, #tpu.memory_space<vmem>>, vector<16x19xf32>
    tpu.vector_store %arg11[%c0_54, %c307], %56 {strides = array<i32>} : memref<16x326xf32, #tpu.memory_space<vmem>>, vector<16x19xf32>,
    %c0_55 = arith.constant 0 : index
    %c0_56 = arith.constant 0 : index
    %60 = vector.load %arg11[%c0_55, %c0_56] : memref<16x326xf32, #tpu.memory_space<vmem>>, vector<16x326xf32>
    %61 = vector.extract_strided_slice %60 {offsets = [0, 0], sizes = [16, 324], strides = [1, 1]} : vector<16x326xf32> to vector<16x324xf32>
    %cst_57 = arith.constant 2.500000e-01 : f32
    %62 = vector.broadcast %cst_57 : f32 to vector<16x324xf32>
    %63 = arith.mulf %62, %61 : vector<16x324xf32>
    %64 = vector.extract_strided_slice %60 {offsets = [0, 1], sizes = [16, 324], strides = [1, 1]} : vector<16x326xf32> to vector<16x324xf32>
    %cst_58 = arith.constant 5.000000e-01 : f32
    %65 = vector.broadcast %cst_58 : f32 to vector<16x324xf32>
    %66 = arith.mulf %65, %64 : vector<16x324xf32>
    %67 = arith.addf %63, %66 : vector<16x324xf32>
    %68 = vector.extract_strided_slice %60 {offsets = [0, 2], sizes = [16, 324], strides = [1, 1]} : vector<16x326xf32> to vector<16x324xf32>
    %cst_59 = arith.constant 2.500000e-01 : f32
    %69 = vector.broadcast %cst_59 : f32 to vector<16x324xf32>
    %70 = arith.mulf %69, %68 : vector<16x324xf32>
    %71 = arith.addf %67, %70 : vector<16x324xf32>
    %72 = vector.extract_strided_slice %71 {offsets = [0, 0], sizes = [16, 288], strides = [1, 1]} : vector<16x324xf32> to vector<16x288xf32>
    %cst_60 = arith.constant 2.500000e-01 : f32
    %73 = vector.broadcast %cst_60 : f32 to vector<16x288xf32>
    %74 = arith.mulf %73, %72 : vector<16x288xf32>
    %75 = vector.extract_strided_slice %71 {offsets = [0, 18], sizes = [16, 288], strides = [1, 1]} : vector<16x324xf32> to vector<16x288xf32>
    %cst_61 = arith.constant 5.000000e-01 : f32
    %76 = vector.broadcast %cst_61 : f32 to vector<16x288xf32>
    %77 = arith.mulf %76, %75 : vector<16x288xf32>
    %78 = arith.addf %74, %77 : vector<16x288xf32>
    %79 = vector.extract_strided_slice %71 {offsets = [0, 36], sizes = [16, 288], strides = [1, 1]} : vector<16x324xf32> to vector<16x288xf32>
    %cst_62 = arith.constant 2.500000e-01 : f32
    %80 = vector.broadcast %cst_62 : f32 to vector<16x288xf32>
    %81 = arith.mulf %80, %79 : vector<16x288xf32>
    %82 = arith.addf %78, %81 : vector<16x288xf32>
    %c0_63 = arith.constant 0 : index
    %c0_64 = arith.constant 0 : index
    %83 = vector.load %arg4[%c0_63, %c0_64] : memref<16x1xf32, #tpu.memory_space<vmem>>, vector<16x1xf32>
    %84 = vector.broadcast %83 : vector<16x1xf32> to vector<16x288xf32>
    %85 = arith.addf %82, %84 : vector<16x288xf32>
    %c0_65 = arith.constant 0 : index
    %c0_66 = arith.constant 0 : index
    %86 = vector.load %arg5[%c0_65, %c0_66] : memref<16x1xf32, #tpu.memory_space<vmem>>, vector<16x1xf32>
    %c0_67 = arith.constant 0 : index
    %c0_68 = arith.constant 0 : index
    %c0_69 = arith.constant 0 : index
    %87 = vector.load %arg6[%c0_67, %c0_68, %c0_69] : memref<1x1x288xf32, #tpu.memory_space<vmem>>, vector<1x1x288xf32>
    %88 = vector.shape_cast %87 : vector<1x1x288xf32> to vector<1x288xf32>
    %89 = vector.broadcast %86 : vector<16x1xf32> to vector<16x288xf32>
    %90 = vector.broadcast %88 : vector<1x288xf32> to vector<16x288xf32>
    %91 = arith.mulf %89, %90 : vector<16x288xf32>
    %92 = arith.addf %85, %91 : vector<16x288xf32>
    %cst_70 = arith.constant 0.000000e+00 : f32
    %93 = vector.broadcast %cst_70 : f32 to vector<16x288xf32>
    %94 = arith.cmpf oge, %92, %93 : vector<16x288xf32>
    %cst_71 = arith.constant 2.000000e-01 : f32
    %95 = vector.broadcast %cst_71 : f32 to vector<16x288xf32>
    %96 = arith.mulf %95, %92 : vector<16x288xf32>
    %97 = arith.select %94, %92, %96 : vector<16x288xi1>, vector<16x288xf32>
    %98 = vector.broadcast %0 : vector<1x288xf32> to vector<16x288xf32>
    %99 = arith.mulf %97, %98 : vector<16x288xf32>
    %cst_72 = arith.constant dense<0.000000e+00> : vector<16xf32>
    %100 = vector.multi_reduction <add>, %99, %cst_72 [1] : vector<16x288xf32> to vector<16xf32>
    %101 = vector.shape_cast %100 : vector<16xf32> to vector<16x1xf32>
    %102 = arith.mulf %99, %99 : vector<16x288xf32>
    %cst_73 = arith.constant dense<0.000000e+00> : vector<16xf32>
    %103 = vector.multi_reduction <add>, %102, %cst_73 [1] : vector<16x288xf32> to vector<16xf32>
    %104 = vector.shape_cast %103 : vector<16xf32> to vector<16x1xf32>
    %cst_74 = arith.constant 3.906250e-03 : f32
    %105 = vector.broadcast %cst_74 : f32 to vector<16x1xf32>
    %106 = arith.mulf %101, %105 : vector<16x1xf32>
    %cst_75 = arith.constant 3.906250e-03 : f32
    %107 = vector.broadcast %cst_75 : f32 to vector<16x1xf32>
    %108 = arith.mulf %104, %107 : vector<16x1xf32>
    %109 = arith.mulf %106, %106 : vector<16x1xf32>
    %110 = arith.subf %108, %109 : vector<16x1xf32>
    %111 = vector.broadcast %106 : vector<16x1xf32> to vector<16x288xf32>
    %112 = arith.subf %97, %111 : vector<16x288xf32>
    %cst_76 = arith.constant 9.99999993E-9 : f32
    %113 = vector.broadcast %cst_76 : f32 to vector<16x1xf32>
    %114 = arith.addf %110, %113 : vector<16x1xf32>
    %115 = math.rsqrt %114 : vector<16x1xf32>
    %116 = vector.broadcast %115 : vector<16x1xf32> to vector<16x288xf32>
    %117 = arith.mulf %112, %116 : vector<16x288xf32>
    %c0_77 = arith.constant 0 : index
    %c0_78 = arith.constant 0 : index
    %c0_79 = arith.constant 0 : index
    %118 = vector.load %arg7[%c0_77, %c0_78, %c0_79] : memref<1x16x1xf32, #tpu.memory_space<vmem>>, vector<1x16x1xf32>
    %119 = vector.shape_cast %118 : vector<1x16x1xf32> to vector<16x1xf32>
    %cst_80 = arith.constant 1.000000e+00 : f32
    %120 = vector.broadcast %cst_80 : f32 to vector<16x1xf32>
    %121 = arith.addf %119, %120 : vector<16x1xf32>
    %122 = vector.broadcast %121 : vector<16x1xf32> to vector<16x288xf32>
    %123 = arith.mulf %117, %122 : vector<16x288xf32>
    %c0_81 = arith.constant 0 : index
    %c0_82 = arith.constant 0 : index
    %c0_83 = arith.constant 0 : index
    %124 = vector.load %arg8[%c0_81, %c0_82, %c0_83] : memref<1x16x1xf32, #tpu.memory_space<vmem>>, vector<1x16x1xf32>
    %125 = vector.shape_cast %124 : vector<1x16x1xf32> to vector<16x1xf32>
    %126 = vector.broadcast %125 : vector<16x1xf32> to vector<16x288xf32>
    %127 = arith.addf %123, %126 : vector<16x288xf32>
    %128 = vector.broadcast %0 : vector<1x288xf32> to vector<16x288xf32>
    %129 = arith.mulf %127, %128 : vector<16x288xf32>
    %cst_84 = arith.constant 0.000000e+00 : bf16
    %130 = vector.broadcast %cst_84 : bf16 to vector<16x19xbf16>
    %c0_85 = arith.constant 0 : index
    %c0_86 = arith.constant 0 : index
    %c0_87 = arith.constant 0 : index
    %131 = vector.load %arg10[%c0_85, %c0_86, %c0_87] : memref<1x16x326xbf16, #tpu.memory_space<vmem>>, vector<1x16x19xbf16>
    %132 = vector.shape_cast %131 : vector<1x16x19xbf16> to vector<16x19xbf16>
    %133 = vector.shape_cast %130 : vector<16x19xbf16> to vector<1x16x19xbf16>
    tpu.vector_store %arg10[%c0_85, %c0_86, %c0_87], %133 {strides = array<i32>} : memref<1x16x326xbf16, #tpu.memory_space<vmem>>, vector<1x16x19xbf16>,
    %134 = arith.truncf %129 : vector<16x288xf32> to vector<16x288xbf16>
    %c0_88 = arith.constant 0 : index
    %c0_89 = arith.constant 0 : index
    %c19_90 = arith.constant 19 : index
    %135 = vector.load %arg10[%c0_88, %c0_89, %c19_90] : memref<1x16x326xbf16, #tpu.memory_space<vmem>>, vector<1x16x288xbf16>
    %136 = vector.shape_cast %135 : vector<1x16x288xbf16> to vector<16x288xbf16>
    %137 = vector.shape_cast %134 : vector<16x288xbf16> to vector<1x16x288xbf16>
    tpu.vector_store %arg10[%c0_88, %c0_89, %c19_90], %137 {strides = array<i32>} : memref<1x16x326xbf16, #tpu.memory_space<vmem>>, vector<1x16x288xbf16>,
    %c0_91 = arith.constant 0 : index
    %c0_92 = arith.constant 0 : index
    %c307_93 = arith.constant 307 : index
    %138 = vector.load %arg10[%c0_91, %c0_92, %c307_93] : memref<1x16x326xbf16, #tpu.memory_space<vmem>>, vector<1x16x19xbf16>
    %139 = vector.shape_cast %138 : vector<1x16x19xbf16> to vector<16x19xbf16>
    %140 = vector.shape_cast %130 : vector<16x19xbf16> to vector<1x16x19xbf16>
    tpu.vector_store %arg10[%c0_91, %c0_92, %c307_93], %140 {strides = array<i32>} : memref<1x16x326xbf16, #tpu.memory_space<vmem>>, vector<1x16x19xbf16>,
    return
  }
  func.func @transform_0(%arg0: i32, %arg1: i32) -> (i32, i32, i32) {
    %c0_i32 = arith.constant 0 : i32
    %c0_i32_0 = arith.constant 0 : i32
    %c0_i32_1 = arith.constant 0 : i32
    return %arg0, %c0_i32, %c0_i32_0 : i32, i32, i32
  }
  func.func @transform_1(%arg0: i32, %arg1: i32) -> (i32, i32, i32) {
    %c0_i32 = arith.constant 0 : i32
    %c0_i32_0 = arith.constant 0 : i32
    %c0_i32_1 = arith.constant 0 : i32
    return %c0_i32, %arg1, %c0_i32_0 : i32, i32, i32
  }
  func.func @transform_2(%arg0: i32, %arg1: i32) -> (i32, i32) {
    %c0_i32 = arith.constant 0 : i32
    %c0_i32_0 = arith.constant 0 : i32
    return %arg1, %c0_i32 : i32, i32
  }
  func.func @transform_3(%arg0: i32, %arg1: i32) -> (i32, i32) {
    %c0_i32 = arith.constant 0 : i32
    %c0_i32_0 = arith.constant 0 : i32
    return %arg1, %c0_i32 : i32, i32
  }
  func.func @transform_4(%arg0: i32, %arg1: i32) -> (i32, i32, i32) {
    %c0_i32 = arith.constant 0 : i32
    %c0_i32_0 = arith.constant 0 : i32
    %c0_i32_1 = arith.constant 0 : i32
    return %arg0, %c0_i32, %c0_i32_0 : i32, i32, i32
  }
  func.func @transform_5(%arg0: i32, %arg1: i32) -> (i32, i32, i32) {
    %c0_i32 = arith.constant 0 : i32
    %c0_i32_0 = arith.constant 0 : i32
    return %arg0, %arg1, %c0_i32 : i32, i32, i32
  }
  func.func @transform_6(%arg0: i32, %arg1: i32) -> (i32, i32, i32) {
    %c0_i32 = arith.constant 0 : i32
    %c0_i32_0 = arith.constant 0 : i32
    return %arg0, %arg1, %c0_i32 : i32, i32, i32
  }
  func.func @transform_7(%arg0: i32, %arg1: i32) -> (i32, i32) {
    %c0_i32 = arith.constant 0 : i32
    %c0_i32_0 = arith.constant 0 : i32
    %c0_i32_1 = arith.constant 0 : i32
    return %c0_i32, %c0_i32_0 : i32, i32
  }
  func.func @transform_8(%arg0: i32, %arg1: i32) -> (i32, i32, i32) {
    %c0_i32 = arith.constant 0 : i32
    %c0_i32_0 = arith.constant 0 : i32
    return %arg0, %arg1, %c0_i32 : i32, i32, i32
  }
}

module attributes {stable_mosaic.version = 11 : i64} {
  func.func @_conv1_epi_kernel(%arg0: i32, %arg1: i32, %arg2: memref<1x16x326xbf16, #tpu.memory_space<vmem>>, %arg3: memref<9x16x16xbf16, #tpu.memory_space<vmem>>, %arg4: memref<16x1xf32, #tpu.memory_space<vmem>>, %arg5: memref<16x1xf32, #tpu.memory_space<vmem>>, %arg6: memref<1x1x288xf32, #tpu.memory_space<vmem>>, %arg7: memref<1x16x1xf32, #tpu.memory_space<vmem>>, %arg8: memref<1x16x1xf32, #tpu.memory_space<vmem>>, %arg9: memref<1x288xf32, #tpu.memory_space<vmem>>, %arg10: memref<1x16x288xf32, #tpu.memory_space<vmem>>) attributes {dimension_semantics = [#tpu.dimension_semantics<parallel>, #tpu.dimension_semantics<parallel>], iteration_bounds = array<i64: 2, 1>, scalar_prefetch = 0 : i64, scratch_operands = 0 : i64, tpu.core_type = #tpu.core_type<tc>, window_params = [{transform_indices = @transform_0, window_bounds = array<i64: 1, 16, 326>}, {transform_indices = @transform_1, window_bounds = array<i64: 9, 16, 16>}, {transform_indices = @transform_2, window_bounds = array<i64: 16, 1>}, {transform_indices = @transform_3, window_bounds = array<i64: 16, 1>}, {transform_indices = @transform_4, window_bounds = array<i64: 1, 1, 288>}, {transform_indices = @transform_5, window_bounds = array<i64: 1, 16, 1>}, {transform_indices = @transform_6, window_bounds = array<i64: 1, 16, 1>}, {pipeline_mode = #tpu.pipeline_mode<synchronous>, transform_indices = @transform_7, window_bounds = array<i64: 1, 288>}, {transform_indices = @transform_8, window_bounds = array<i64: 1, 16, 288>}]} {
    %c0 = arith.constant 0 : index
    %c0_0 = arith.constant 0 : index
    %0 = vector.load %arg9[%c0, %c0_0] : memref<1x288xf32, #tpu.memory_space<vmem>>, vector<1x288xf32>
    %c0_1 = arith.constant 0 : index
    %c0_2 = arith.constant 0 : index
    %c0_3 = arith.constant 0 : index
    %1 = vector.load %arg3[%c0_1, %c0_2, %c0_3] : memref<9x16x16xbf16, #tpu.memory_space<vmem>>, vector<1x16x16xbf16>
    %2 = vector.shape_cast %1 : vector<1x16x16xbf16> to vector<16x16xbf16>
    %c0_4 = arith.constant 0 : index
    %c0_5 = arith.constant 0 : index
    %c0_6 = arith.constant 0 : index
    %3 = vector.load %arg2[%c0_4, %c0_5, %c0_6] : memref<1x16x326xbf16, #tpu.memory_space<vmem>>, vector<1x16x288xbf16>
    %4 = vector.shape_cast %3 : vector<1x16x288xbf16> to vector<16x288xbf16>
    %cst = arith.constant dense<0.000000e+00> : vector<16x288xf32>
    %5 = tpu.matmul %2, %4, %cst {dimension_numbers = #tpu.dot_dimension_numbers<[1], [0], [0], [1], [0, 0, 1, 1], [], []>} : vector<16x16xbf16>, vector<16x288xbf16>, vector<16x288xf32> -> vector<16x288xf32>
    %c1 = arith.constant 1 : index
    %c0_7 = arith.constant 0 : index
    %c0_8 = arith.constant 0 : index
    %6 = vector.load %arg3[%c1, %c0_7, %c0_8] : memref<9x16x16xbf16, #tpu.memory_space<vmem>>, vector<1x16x16xbf16>
    %7 = vector.shape_cast %6 : vector<1x16x16xbf16> to vector<16x16xbf16>
    %c0_9 = arith.constant 0 : index
    %c0_10 = arith.constant 0 : index
    %c1_11 = arith.constant 1 : index
    %8 = vector.load %arg2[%c0_9, %c0_10, %c1_11] : memref<1x16x326xbf16, #tpu.memory_space<vmem>>, vector<1x16x288xbf16>
    %9 = vector.shape_cast %8 : vector<1x16x288xbf16> to vector<16x288xbf16>
    %cst_12 = arith.constant dense<0.000000e+00> : vector<16x288xf32>
    %10 = tpu.matmul %7, %9, %cst_12 {dimension_numbers = #tpu.dot_dimension_numbers<[1], [0], [0], [1], [0, 0, 1, 1], [], []>} : vector<16x16xbf16>, vector<16x288xbf16>, vector<16x288xf32> -> vector<16x288xf32>
    %11 = arith.addf %5, %10 : vector<16x288xf32>
    %c2 = arith.constant 2 : index
    %c0_13 = arith.constant 0 : index
    %c0_14 = arith.constant 0 : index
    %12 = vector.load %arg3[%c2, %c0_13, %c0_14] : memref<9x16x16xbf16, #tpu.memory_space<vmem>>, vector<1x16x16xbf16>
    %13 = vector.shape_cast %12 : vector<1x16x16xbf16> to vector<16x16xbf16>
    %c0_15 = arith.constant 0 : index
    %c0_16 = arith.constant 0 : index
    %c2_17 = arith.constant 2 : index
    %14 = vector.load %arg2[%c0_15, %c0_16, %c2_17] : memref<1x16x326xbf16, #tpu.memory_space<vmem>>, vector<1x16x288xbf16>
    %15 = vector.shape_cast %14 : vector<1x16x288xbf16> to vector<16x288xbf16>
    %cst_18 = arith.constant dense<0.000000e+00> : vector<16x288xf32>
    %16 = tpu.matmul %13, %15, %cst_18 {dimension_numbers = #tpu.dot_dimension_numbers<[1], [0], [0], [1], [0, 0, 1, 1], [], []>} : vector<16x16xbf16>, vector<16x288xbf16>, vector<16x288xf32> -> vector<16x288xf32>
    %17 = arith.addf %11, %16 : vector<16x288xf32>
    %c3 = arith.constant 3 : index
    %c0_19 = arith.constant 0 : index
    %c0_20 = arith.constant 0 : index
    %18 = vector.load %arg3[%c3, %c0_19, %c0_20] : memref<9x16x16xbf16, #tpu.memory_space<vmem>>, vector<1x16x16xbf16>
    %19 = vector.shape_cast %18 : vector<1x16x16xbf16> to vector<16x16xbf16>
    %c0_21 = arith.constant 0 : index
    %c0_22 = arith.constant 0 : index
    %c18 = arith.constant 18 : index
    %20 = vector.load %arg2[%c0_21, %c0_22, %c18] : memref<1x16x326xbf16, #tpu.memory_space<vmem>>, vector<1x16x288xbf16>
    %21 = vector.shape_cast %20 : vector<1x16x288xbf16> to vector<16x288xbf16>
    %cst_23 = arith.constant dense<0.000000e+00> : vector<16x288xf32>
    %22 = tpu.matmul %19, %21, %cst_23 {dimension_numbers = #tpu.dot_dimension_numbers<[1], [0], [0], [1], [0, 0, 1, 1], [], []>} : vector<16x16xbf16>, vector<16x288xbf16>, vector<16x288xf32> -> vector<16x288xf32>
    %23 = arith.addf %17, %22 : vector<16x288xf32>
    %c4 = arith.constant 4 : index
    %c0_24 = arith.constant 0 : index
    %c0_25 = arith.constant 0 : index
    %24 = vector.load %arg3[%c4, %c0_24, %c0_25] : memref<9x16x16xbf16, #tpu.memory_space<vmem>>, vector<1x16x16xbf16>
    %25 = vector.shape_cast %24 : vector<1x16x16xbf16> to vector<16x16xbf16>
    %c0_26 = arith.constant 0 : index
    %c0_27 = arith.constant 0 : index
    %c19 = arith.constant 19 : index
    %26 = vector.load %arg2[%c0_26, %c0_27, %c19] : memref<1x16x326xbf16, #tpu.memory_space<vmem>>, vector<1x16x288xbf16>
    %27 = vector.shape_cast %26 : vector<1x16x288xbf16> to vector<16x288xbf16>
    %cst_28 = arith.constant dense<0.000000e+00> : vector<16x288xf32>
    %28 = tpu.matmul %25, %27, %cst_28 {dimension_numbers = #tpu.dot_dimension_numbers<[1], [0], [0], [1], [0, 0, 1, 1], [], []>} : vector<16x16xbf16>, vector<16x288xbf16>, vector<16x288xf32> -> vector<16x288xf32>
    %29 = arith.addf %23, %28 : vector<16x288xf32>
    %c5 = arith.constant 5 : index
    %c0_29 = arith.constant 0 : index
    %c0_30 = arith.constant 0 : index
    %30 = vector.load %arg3[%c5, %c0_29, %c0_30] : memref<9x16x16xbf16, #tpu.memory_space<vmem>>, vector<1x16x16xbf16>
    %31 = vector.shape_cast %30 : vector<1x16x16xbf16> to vector<16x16xbf16>
    %c0_31 = arith.constant 0 : index
    %c0_32 = arith.constant 0 : index
    %c20 = arith.constant 20 : index
    %32 = vector.load %arg2[%c0_31, %c0_32, %c20] : memref<1x16x326xbf16, #tpu.memory_space<vmem>>, vector<1x16x288xbf16>
    %33 = vector.shape_cast %32 : vector<1x16x288xbf16> to vector<16x288xbf16>
    %cst_33 = arith.constant dense<0.000000e+00> : vector<16x288xf32>
    %34 = tpu.matmul %31, %33, %cst_33 {dimension_numbers = #tpu.dot_dimension_numbers<[1], [0], [0], [1], [0, 0, 1, 1], [], []>} : vector<16x16xbf16>, vector<16x288xbf16>, vector<16x288xf32> -> vector<16x288xf32>
    %35 = arith.addf %29, %34 : vector<16x288xf32>
    %c6 = arith.constant 6 : index
    %c0_34 = arith.constant 0 : index
    %c0_35 = arith.constant 0 : index
    %36 = vector.load %arg3[%c6, %c0_34, %c0_35] : memref<9x16x16xbf16, #tpu.memory_space<vmem>>, vector<1x16x16xbf16>
    %37 = vector.shape_cast %36 : vector<1x16x16xbf16> to vector<16x16xbf16>
    %c0_36 = arith.constant 0 : index
    %c0_37 = arith.constant 0 : index
    %c36 = arith.constant 36 : index
    %38 = vector.load %arg2[%c0_36, %c0_37, %c36] : memref<1x16x326xbf16, #tpu.memory_space<vmem>>, vector<1x16x288xbf16>
    %39 = vector.shape_cast %38 : vector<1x16x288xbf16> to vector<16x288xbf16>
    %cst_38 = arith.constant dense<0.000000e+00> : vector<16x288xf32>
    %40 = tpu.matmul %37, %39, %cst_38 {dimension_numbers = #tpu.dot_dimension_numbers<[1], [0], [0], [1], [0, 0, 1, 1], [], []>} : vector<16x16xbf16>, vector<16x288xbf16>, vector<16x288xf32> -> vector<16x288xf32>
    %41 = arith.addf %35, %40 : vector<16x288xf32>
    %c7 = arith.constant 7 : index
    %c0_39 = arith.constant 0 : index
    %c0_40 = arith.constant 0 : index
    %42 = vector.load %arg3[%c7, %c0_39, %c0_40] : memref<9x16x16xbf16, #tpu.memory_space<vmem>>, vector<1x16x16xbf16>
    %43 = vector.shape_cast %42 : vector<1x16x16xbf16> to vector<16x16xbf16>
    %c0_41 = arith.constant 0 : index
    %c0_42 = arith.constant 0 : index
    %c37 = arith.constant 37 : index
    %44 = vector.load %arg2[%c0_41, %c0_42, %c37] : memref<1x16x326xbf16, #tpu.memory_space<vmem>>, vector<1x16x288xbf16>
    %45 = vector.shape_cast %44 : vector<1x16x288xbf16> to vector<16x288xbf16>
    %cst_43 = arith.constant dense<0.000000e+00> : vector<16x288xf32>
    %46 = tpu.matmul %43, %45, %cst_43 {dimension_numbers = #tpu.dot_dimension_numbers<[1], [0], [0], [1], [0, 0, 1, 1], [], []>} : vector<16x16xbf16>, vector<16x288xbf16>, vector<16x288xf32> -> vector<16x288xf32>
    %47 = arith.addf %41, %46 : vector<16x288xf32>
    %c8 = arith.constant 8 : index
    %c0_44 = arith.constant 0 : index
    %c0_45 = arith.constant 0 : index
    %48 = vector.load %arg3[%c8, %c0_44, %c0_45] : memref<9x16x16xbf16, #tpu.memory_space<vmem>>, vector<1x16x16xbf16>
    %49 = vector.shape_cast %48 : vector<1x16x16xbf16> to vector<16x16xbf16>
    %c0_46 = arith.constant 0 : index
    %c0_47 = arith.constant 0 : index
    %c38 = arith.constant 38 : index
    %50 = vector.load %arg2[%c0_46, %c0_47, %c38] : memref<1x16x326xbf16, #tpu.memory_space<vmem>>, vector<1x16x288xbf16>
    %51 = vector.shape_cast %50 : vector<1x16x288xbf16> to vector<16x288xbf16>
    %cst_48 = arith.constant dense<0.000000e+00> : vector<16x288xf32>
    %52 = tpu.matmul %49, %51, %cst_48 {dimension_numbers = #tpu.dot_dimension_numbers<[1], [0], [0], [1], [0, 0, 1, 1], [], []>} : vector<16x16xbf16>, vector<16x288xbf16>, vector<16x288xf32> -> vector<16x288xf32>
    %53 = arith.addf %47, %52 : vector<16x288xf32>
    %c0_49 = arith.constant 0 : index
    %c0_50 = arith.constant 0 : index
    %54 = vector.load %arg4[%c0_49, %c0_50] : memref<16x1xf32, #tpu.memory_space<vmem>>, vector<16x1xf32>
    %55 = vector.broadcast %54 : vector<16x1xf32> to vector<16x288xf32>
    %56 = arith.addf %53, %55 : vector<16x288xf32>
    %c0_51 = arith.constant 0 : index
    %c0_52 = arith.constant 0 : index
    %57 = vector.load %arg5[%c0_51, %c0_52] : memref<16x1xf32, #tpu.memory_space<vmem>>, vector<16x1xf32>
    %c0_53 = arith.constant 0 : index
    %c0_54 = arith.constant 0 : index
    %c0_55 = arith.constant 0 : index
    %58 = vector.load %arg6[%c0_53, %c0_54, %c0_55] : memref<1x1x288xf32, #tpu.memory_space<vmem>>, vector<1x1x288xf32>
    %59 = vector.shape_cast %58 : vector<1x1x288xf32> to vector<1x288xf32>
    %60 = vector.broadcast %57 : vector<16x1xf32> to vector<16x288xf32>
    %61 = vector.broadcast %59 : vector<1x288xf32> to vector<16x288xf32>
    %62 = arith.mulf %60, %61 : vector<16x288xf32>
    %63 = arith.addf %56, %62 : vector<16x288xf32>
    %cst_56 = arith.constant 0.000000e+00 : f32
    %64 = vector.broadcast %cst_56 : f32 to vector<16x288xf32>
    %65 = arith.cmpf oge, %63, %64 : vector<16x288xf32>
    %cst_57 = arith.constant 2.000000e-01 : f32
    %66 = vector.broadcast %cst_57 : f32 to vector<16x288xf32>
    %67 = arith.mulf %66, %63 : vector<16x288xf32>
    %68 = arith.select %65, %63, %67 : vector<16x288xi1>, vector<16x288xf32>
    %69 = vector.broadcast %0 : vector<1x288xf32> to vector<16x288xf32>
    %70 = arith.mulf %68, %69 : vector<16x288xf32>
    %cst_58 = arith.constant dense<0.000000e+00> : vector<16xf32>
    %71 = vector.multi_reduction <add>, %70, %cst_58 [1] : vector<16x288xf32> to vector<16xf32>
    %72 = vector.shape_cast %71 : vector<16xf32> to vector<16x1xf32>
    %73 = arith.mulf %70, %70 : vector<16x288xf32>
    %cst_59 = arith.constant dense<0.000000e+00> : vector<16xf32>
    %74 = vector.multi_reduction <add>, %73, %cst_59 [1] : vector<16x288xf32> to vector<16xf32>
    %75 = vector.shape_cast %74 : vector<16xf32> to vector<16x1xf32>
    %cst_60 = arith.constant 3.906250e-03 : f32
    %76 = vector.broadcast %cst_60 : f32 to vector<16x1xf32>
    %77 = arith.mulf %72, %76 : vector<16x1xf32>
    %cst_61 = arith.constant 3.906250e-03 : f32
    %78 = vector.broadcast %cst_61 : f32 to vector<16x1xf32>
    %79 = arith.mulf %75, %78 : vector<16x1xf32>
    %80 = arith.mulf %77, %77 : vector<16x1xf32>
    %81 = arith.subf %79, %80 : vector<16x1xf32>
    %82 = vector.broadcast %77 : vector<16x1xf32> to vector<16x288xf32>
    %83 = arith.subf %68, %82 : vector<16x288xf32>
    %cst_62 = arith.constant 9.99999993E-9 : f32
    %84 = vector.broadcast %cst_62 : f32 to vector<16x1xf32>
    %85 = arith.addf %81, %84 : vector<16x1xf32>
    %86 = math.rsqrt %85 : vector<16x1xf32>
    %87 = vector.broadcast %86 : vector<16x1xf32> to vector<16x288xf32>
    %88 = arith.mulf %83, %87 : vector<16x288xf32>
    %c0_63 = arith.constant 0 : index
    %c0_64 = arith.constant 0 : index
    %c0_65 = arith.constant 0 : index
    %89 = vector.load %arg7[%c0_63, %c0_64, %c0_65] : memref<1x16x1xf32, #tpu.memory_space<vmem>>, vector<1x16x1xf32>
    %90 = vector.shape_cast %89 : vector<1x16x1xf32> to vector<16x1xf32>
    %cst_66 = arith.constant 1.000000e+00 : f32
    %91 = vector.broadcast %cst_66 : f32 to vector<16x1xf32>
    %92 = arith.addf %90, %91 : vector<16x1xf32>
    %93 = vector.broadcast %92 : vector<16x1xf32> to vector<16x288xf32>
    %94 = arith.mulf %88, %93 : vector<16x288xf32>
    %c0_67 = arith.constant 0 : index
    %c0_68 = arith.constant 0 : index
    %c0_69 = arith.constant 0 : index
    %95 = vector.load %arg8[%c0_67, %c0_68, %c0_69] : memref<1x16x1xf32, #tpu.memory_space<vmem>>, vector<1x16x1xf32>
    %96 = vector.shape_cast %95 : vector<1x16x1xf32> to vector<16x1xf32>
    %97 = vector.broadcast %96 : vector<16x1xf32> to vector<16x288xf32>
    %98 = arith.addf %94, %97 : vector<16x288xf32>
    %c0_70 = arith.constant 0 : index
    %c0_71 = arith.constant 0 : index
    %c0_72 = arith.constant 0 : index
    %99 = vector.load %arg10[%c0_70, %c0_71, %c0_72] : memref<1x16x288xf32, #tpu.memory_space<vmem>>, vector<1x16x288xf32>
    %100 = vector.shape_cast %99 : vector<1x16x288xf32> to vector<16x288xf32>
    %101 = vector.shape_cast %98 : vector<16x288xf32> to vector<1x16x288xf32>
    tpu.vector_store %arg10[%c0_70, %c0_71, %c0_72], %101 {strides = array<i32>} : memref<1x16x288xf32, #tpu.memory_space<vmem>>, vector<1x16x288xf32>,
    return
  }
  func.func @transform_0(%arg0: i32, %arg1: i32) -> (i32, i32, i32) {
    %c0_i32 = arith.constant 0 : i32
    %c0_i32_0 = arith.constant 0 : i32
    %c0_i32_1 = arith.constant 0 : i32
    return %arg0, %c0_i32, %c0_i32_0 : i32, i32, i32
  }
  func.func @transform_1(%arg0: i32, %arg1: i32) -> (i32, i32, i32) {
    %c0_i32 = arith.constant 0 : i32
    %c0_i32_0 = arith.constant 0 : i32
    %c0_i32_1 = arith.constant 0 : i32
    return %c0_i32, %arg1, %c0_i32_0 : i32, i32, i32
  }
  func.func @transform_2(%arg0: i32, %arg1: i32) -> (i32, i32) {
    %c0_i32 = arith.constant 0 : i32
    %c0_i32_0 = arith.constant 0 : i32
    return %arg1, %c0_i32 : i32, i32
  }
  func.func @transform_3(%arg0: i32, %arg1: i32) -> (i32, i32) {
    %c0_i32 = arith.constant 0 : i32
    %c0_i32_0 = arith.constant 0 : i32
    return %arg1, %c0_i32 : i32, i32
  }
  func.func @transform_4(%arg0: i32, %arg1: i32) -> (i32, i32, i32) {
    %c0_i32 = arith.constant 0 : i32
    %c0_i32_0 = arith.constant 0 : i32
    %c0_i32_1 = arith.constant 0 : i32
    return %arg0, %c0_i32, %c0_i32_0 : i32, i32, i32
  }
  func.func @transform_5(%arg0: i32, %arg1: i32) -> (i32, i32, i32) {
    %c0_i32 = arith.constant 0 : i32
    %c0_i32_0 = arith.constant 0 : i32
    return %arg0, %arg1, %c0_i32 : i32, i32, i32
  }
  func.func @transform_6(%arg0: i32, %arg1: i32) -> (i32, i32, i32) {
    %c0_i32 = arith.constant 0 : i32
    %c0_i32_0 = arith.constant 0 : i32
    return %arg0, %arg1, %c0_i32 : i32, i32, i32
  }
  func.func @transform_7(%arg0: i32, %arg1: i32) -> (i32, i32) {
    %c0_i32 = arith.constant 0 : i32
    %c0_i32_0 = arith.constant 0 : i32
    %c0_i32_1 = arith.constant 0 : i32
    return %c0_i32, %c0_i32_0 : i32, i32
  }
  func.func @transform_8(%arg0: i32, %arg1: i32) -> (i32, i32, i32) {
    %c0_i32 = arith.constant 0 : i32
    %c0_i32_0 = arith.constant 0 : i32
    return %arg0, %arg1, %c0_i32 : i32, i32, i32
  }
}

</mosaic_0001>

<bundles_post_ra>
// kernel: synthesis_block_forward.3
= control target key start
LH: loop header
LB: loop body
LE: loop exit
PB: predicated region body
PF: predicated region fallthrough
CT: control target
= control target key end

     0   :  { %s2180_s27 = smov 0   ;;  %s2182_s28 = smov 0   ;;  %s2395_s0 = inlined_call_operand.vmem [shape: bf16[2,16,326], index: 0, kind: input, shape index: {}]   ;;  %s2396_s1 = inlined_call_operand.vmem [shape: bf16[9,16,16], index: 1, kind: input, shape index: {}]   ;;  %s2397_s2 = inlined_call_operand.vmem [shape: f32[16,1], index: 2, kind: input, shape index: {}]   ;;  %s2398_s3 = inlined_call_operand.vmem [shape: f32[16,1], index: 3, kind: input, shape index: {}]   ;;  %s2399_s4 = inlined_call_operand.vmem [shape: f32[2,1,288], index: 4, kind: input, shape index: {}]   ;;  %s2400_s5 = inlined_call_operand.vmem [shape: f32[2,16,1], index: 5, kind: input, shape index: {}]   ;;  %s2401_s6 = inlined_call_operand.vmem [shape: f32[2,16,1], index: 6, kind: input, shape index: {}]   ;;  %s2402_s7 = inlined_call_operand.vmem [shape: f32[1,288], index: 7, kind: input, shape index: {}]   ;;  %s2403_s8 = inlined_call_operand.vmem [shape: f32[2,16,288], index: 8, kind: output, shape index: {}]  }
   0x1   :  { %s2184_s29 = smov 0  }
   0x2 LB: > { %s30_s30 = sadd.s32 1, %s2118_s28  ;;  %p1882_p0 = scmp.ge.s32.totalorder %s2122_s29, 1  ;;  %s2122_s29 = sphi %s2184_s29, %s18_s29   ;;  %s2118_s28 = sphi %s2182_s28, %s2405_s28   ;;  %s2114_s27 = sphi %s2180_s27, %s2404_s27  }
   0x3   : > { %p32_p1 = scmp.ge.s32.totalorder %s30_s30, 2  ;;  %p352_p2 = scmp.lt.s32.totalorder %s2122_s29, 3 }
   0x5   : > { %s2407_s30 = smov (%p32_p1, %s30_s30), 0  ;;  %p353_p3 = pnand %p1882_p0, %p352_p2 }
   0x6   : > { %p428_p4 = scmp.lt.s32.totalorder (!%p353_p3), %s2114_s27, 1  ;;  %v2124_v0 = vmov (!%p353_p3), 0.0   ;;  %vm2125_vm0 = vmmov (!%p353_p3), 0   ;;  %v2126_v1 = vmov (!%p353_p3), 0   ;;  %s2127_s13 = smov (!%p353_p3), 127   ;;  %v1502_v5 = vld [vmem:[%s2397_s2 + $0x8] sm:$0xff] (!%p353_p3) }
   0x7   : > { %356 = sbr.rel (%p353_p3) target bundleno = 638 (0x27e), region = 52  ;;  %1957 = vmatprep.subr.bf16.mxu1 (!%p353_p3), %v2124_v0  ;;  %1959 = vmatprep.mubr.msk.bf16.mxu1 (!%p353_p3), %vm2125_vm0, %v2124_v0  ;;  %s2128_s14 = smov (!%p353_p3), 126   ;;  %v1501_v6 = vld [vmem:[%s2397_s2] sm:$0xff] (!%p353_p3)  ;;  %v1520_v8 = vld [vmem:[%s2398_s3 + $0x8] sm:$0xff] (!%p353_p3)  ;;  %vm521_vm1 = vcmask (!%p353_p3), 1039360   ;;  %vm527_vm2 = vcmask (!%p353_p3), 130048  }
   0x8   : > { %563 = vmatprep.mubr.bf16.mxu0 (!%p353_p3), %v2126_v1  ;;  %2082 = vset.pattern.permute.xlu1 (!%p353_p3), %v2126_v1  ;;  %s2129_s15 = smov (!%p353_p3), 110   ;;  %s2130_s16 = smov (!%p353_p3), 109   ;;  %v1519_v7 = vld [vmem:[%s2398_s3] sm:$0xff] (!%p353_p3)  ;;  %v2087_v16 = vld [vmem:[%s2396_s1 + $0x8] sm:$0xff] (!%p353_p3)   ;;  %vm724_vm3 = vcmask (!%p353_p3), 1031168   ;;  %vm837_vm4 = vcmask (!%p353_p3), 900096  }
   0x9   : > { %2081 = vset.pattern.permute.xlu0 (!%p353_p3), %v2126_v1  ;;  %s2131_s17 = smov (!%p353_p3), 108   ;;  %s2132_s18 = smov (!%p353_p3), 92   ;;  %v2088_v22 = vld [vmem:[%s2396_s1] sm:$0xff] (!%p353_p3)   ;;  %v2089_v26 = vld [vmem:[%s2396_s1 + $0x10] sm:$0xff] (!%p353_p3)   ;;  %v2090_v31 = vld [vmem:[%s2396_s1 + $0x18] sm:$0xff] (!%p353_p3)   ;;  %vm950_vm5 = vcmask (!%p353_p3), 891904  }
   0xa   : > { %s2133_s19 = smov (!%p353_p3), 91   ;;  %s2134_s20 = smov (!%p353_p3), 90   ;;  %v2091_v37 = vld [vmem:[%s2396_s1 + $0x20] sm:$0xff] (!%p353_p3)   ;;  %vm1063_vm6 = vcmask (!%p353_p3), 883712   ;;  %v2092_v42 = vld [vmem:[%s2396_s1 + $0x28] sm:$0xff] (!%p353_p3)   ;;  %v2093_v47 = vld [vmem:[%s2396_s1 + $0x30] sm:$0xff] (!%p353_p3)  }
   0xb   : > { %vm1176_vm7 = vcmask (!%p353_p3), 752640   ;;  %v2094_v52 = vld [vmem:[%s2396_s1 + $0x38] sm:$0xff] (!%p353_p3)   ;;  %vm1289_vm8 = vcmask (!%p353_p3), 744448   ;;  %v2095_v55 = vld [vmem:[%s2396_s1 + $0x40] sm:$0xff] (!%p353_p3)   ;;  %vm1402_vm9 = vcmask (!%p353_p3), 736256  }
   0xe   : > { %s2409_s27 = smov (!%p428_p4, %s2114_s27), 1 }
   0xf   : > { %s2043_s9 = smul.u32 24, %s2409_s27  ;;  %s1937_s25 = sshll.u32 %s2409_s27, 4 }
  0x10   : > { %s473_s24 = scalar_lea.vmem %s2401_s6, %s1937_s25 }
  0x11   : > { %s432_s12 = scalar_lea.vmem %s2395_s0, %s2043_s9 }
  0x12   : > { %v2210_v2 = vld [vmem:[%s432_s12 + $0x4] ss:$12 sps:$4 sm:$0xff]   ;;  %v2212_v3 = vld [vmem:[%s432_s12] ss:$12 sps:$4 sm:$0xff]   ;;  %v2215_v4 = vld [vmem:[%s432_s12 + $0x8] ss:$12 sps:$4 sm:$0xff]   ;;  %s463_s12 = scalar_lea.vmem %s2400_s5, %s1937_s25 }
  0x13   : > { %517 = vrot.lane.b32.xlu0 %v2210_v2, %s2127_s13  ;;  %515 = vrot.lane.b32.xlu1 %v2212_v3, %s2127_s13  ;;  %v1651_v9 = vld [vmem:[%s463_s12] sm:$0xff]  ;;  %v1652_v10 = vld [vmem:[%s463_s12 + $0x8] sm:$0xff]  ;;  %s2045_s25 = smul.u32 48, %s2409_s27 }
  0x14   : > { %v1653_v11 = vadd.f32 1.0, %v1651_v9  ;;  %v1654_v12 = vadd.f32 1.0, %v1652_v10 }
  0x15   : > { %s484_s10 = scalar_lea.vmem %s2403_s8, %s2045_s25 }
  0x17   : > { %519 = vrot.lane.b32.xlu0 %v2215_v4, %s2127_s13  ;;  %720 = vrot.lane.b32.xlu1 %v2210_v2, %s2128_s14 }
  0x1b   : > { %722 = vrot.lane.b32.xlu0 %v2215_v4, %s2128_s14  ;;  %718 = vrot.lane.b32.xlu1 %v2212_v3, %s2128_s14 }
  0x1f   : > { %833 = vrot.lane.b32.xlu0 %v2210_v2, %s2129_s15  ;;  %835 = vrot.lane.b32.xlu1 %v2215_v4, %s2129_s15 }
  0x23   : > { %831 = vrot.lane.b32.xlu0 %v2212_v3, %s2129_s15  ;;  %946 = vrot.lane.b32.xlu1 %v2210_v2, %s2130_s16 }
  0x27   : > { %948 = vrot.lane.b32.xlu0 %v2215_v4, %s2130_s16  ;;  %944 = vrot.lane.b32.xlu1 %v2212_v3, %s2130_s16  ;;  %s2044_s16 = smul.u32 3, %s2409_s27 }
  0x2b   : > { %1059 = vrot.lane.b32.xlu0 %v2210_v2, %s2131_s17  ;;  %1061 = vrot.lane.b32.xlu1 %v2215_v4, %s2131_s17 }
  0x2f   : > { %1057 = vrot.lane.b32.xlu0 %v2212_v3, %s2131_s17  ;;  %1172 = vrot.lane.b32.xlu1 %v2210_v2, %s2132_s18 }
  0x33   : > { %1174 = vrot.lane.b32.xlu0 %v2215_v4, %s2132_s18  ;;  %1170 = vrot.lane.b32.xlu1 %v2212_v3, %s2132_s18 }
  0x37   : > { %1285 = vrot.lane.b32.xlu0 %v2210_v2, %s2133_s19  ;;  %1287 = vrot.lane.b32.xlu1 %v2215_v4, %s2133_s19 }
  0x3b   : > { %1283 = vrot.lane.b32.xlu0 %v2212_v3, %s2133_s19  ;;  %1398 = vrot.lane.b32.xlu1 %v2210_v2, %s2134_s20  ;;  %s454_s19 = scalar_lea.vmem %s2399_s4, %s2044_s16 }
  0x3f   : > { %1400 = vrot.lane.b32.xlu0 %v2215_v4, %s2134_s20  ;;  %1396 = vrot.lane.b32.xlu1 %v2212_v3, %s2134_s20 }
  0x43   : > { %1510 = vperm.xlu1 %2082, %v1502_v5   ;;  %1505 = vperm.xlu0 %2081, %v1501_v6  }
  0x47   : > { %1524 = vperm.xlu1 %2082, %v1519_v7   ;;  %1529 = vperm.xlu0 %2081, %v1520_v8  }
  0x4b   : > { %1657 = vperm.xlu0 %2081, %v1653_v11   ;;  %1662 = vperm.xlu1 %2082, %v1654_v12  }
  0x85   : > { %v518_v13 = vpop.permute.xlu0 %517  ;;  %v516_v14 = vpop.permute.xlu1 %515 }
  0x86   : > { %v522_v18 = vsel %vm521_vm1, %v516_v14, %v518_v13 }
  0x89   : > { %v520_v15 = vpop.permute.xlu0 %519  ;;  %v721_v19 = vpop.permute.xlu1 %720 }
  0x8a   : > { %1958 = vmatpush3.bf16.msra.mxu1 %v520_v15  ;;  %v523_v17 = vsel %vm521_vm1, %v518_v13, %v520_v15 }
  0x8b   : > { %531 = vmatprep.subr.bf16.mxu0 %v523_v17  ;;  %1963 = vmatprep.subr.bf16.mxu1 %v2124_v0 }
  0x8c   : > { %532 = vmatpush1.bf16.msra.mxu0 %v522_v18 }
  0x8d   : > { %1960 = vmatmul.mubr.msk.bf16.vlgmr.msra.gmra.mrb[0].mxu1 %vm527_vm2, %v2087_v16  ;;  %626 = vmatprep.subr.bf16.mxu0 %v2210_v2  ;;  %v723_v20 = vpop.permute.xlu0 %722  ;;  %v719_v23 = vpop.permute.xlu1 %718 }
  0x8e   : > { %1964 = vmatpush3.bf16.msra.mxu1 %v2215_v4  ;;  %1965 = vmatprep.mubr.msk.bf16.mxu1 %vm2125_vm0, %v2124_v0  ;;  %v726_v21 = vsel %vm724_vm3, %v721_v19, %v723_v20  ;;  %v725_v25 = vsel %vm724_vm3, %v719_v23, %v721_v19 }
  0x8f   : > { %1895 = vmatmul.mubr.msk.bf16.vlgmr.msra.gmra.mrb[0].mxu0 %vm527_vm2, %v2087_v16  ;;  %1969 = vmatprep.subr.bf16.mxu1 %v2124_v0 }
  0x90   : > { %627 = vmatpush1.bf16.msra.mxu0 %v2212_v3  ;;  %658 = vmatprep.mubr.bf16.mxu0 %v2126_v1 }
  0x91   : > { %733 = vmatprep.subr.bf16.mxu0 %v726_v21  ;;  %v834_v24 = vpop.permute.xlu0 %833  ;;  %v836_v27 = vpop.permute.xlu1 %835 }
  0x92   : > { %v839_v28 = vsel %vm837_vm4, %v834_v24, %v836_v27 }
  0x95   : > { %1966 = vmatmul.mubr.msk.bf16.vlgmr.msra.gmra.mrb[4].mxu1 %vm527_vm2, %v2088_v22  ;;  %v832_v29 = vpop.permute.xlu0 %831  ;;  %v947_v30 = vpop.permute.xlu1 %946 }
  0x96   : > { %1970 = vmatpush3.bf16.msra.mxu1 %v723_v20  ;;  %1971 = vmatprep.mubr.msk.bf16.mxu1 %vm2125_vm0, %v2124_v0  ;;  %v838_v33 = vsel %vm837_vm4, %v832_v29, %v834_v24 }
  0x97   : > { %1975 = vmatprep.subr.bf16.mxu1 %v2124_v0 }
  0x99   : > { %v949_v32 = vpop.permute.xlu0 %948  ;;  %v945_v34 = vpop.permute.xlu1 %944 }
  0x9a   : > { %v952_v35 = vsel %vm950_vm5, %v947_v30, %v949_v32  ;;  %v951_v41 = vsel %vm950_vm5, %v945_v34, %v947_v30 }
  0x9b   : > { %1898 = vmatmul.mubr.msk.bf16.vlgmr.msra.gmra.mrb[0].mxu0 %vm527_vm2, %v2088_v22 }
  0x9c   : > { %734 = vmatpush1.bf16.msra.mxu0 %v725_v25  ;;  %765 = vmatprep.mubr.bf16.mxu0 %v2126_v1 }
  0x9d   : > { %1972 = vmatmul.mubr.msk.bf16.vlgmr.msra.gmra.mrb[8].mxu1 %vm527_vm2, %v2089_v26  ;;  %846 = vmatprep.subr.bf16.mxu0 %v839_v28  ;;  %v1060_v36 = vpop.permute.xlu0 %1059  ;;  %v1062_v38 = vpop.permute.xlu1 %1061 }
  0x9e   : > { %1976 = vmatpush3.bf16.msra.mxu1 %v836_v27  ;;  %1977 = vmatprep.mubr.msk.bf16.mxu1 %vm2125_vm0, %v2124_v0  ;;  %v1065_v43 = vsel %vm1063_vm6, %v1060_v36, %v1062_v38 }
  0x9f   : > { %1981 = vmatprep.subr.bf16.mxu1 %v2124_v0 }
  0xa1   : > { %v1058_v39 = vpop.permute.xlu0 %1057  ;;  %v1173_v40 = vpop.permute.xlu1 %1172 }
  0xa2   : > { %v1064_v49 = vsel %vm1063_vm6, %v1058_v39, %v1060_v36 }
  0xa5   : > { %1978 = vmatmul.mubr.msk.bf16.vlgmr.msra.gmra.mrb[12].mxu1 %vm527_vm2, %v2090_v31  ;;  %v1175_v44 = vpop.permute.xlu0 %1174  ;;  %v1171_v45 = vpop.permute.xlu1 %1170 }
  0xa6   : > { %1982 = vmatpush3.bf16.msra.mxu1 %v949_v32  ;;  %1983 = vmatprep.mubr.msk.bf16.mxu1 %vm2125_vm0, %v2124_v0  ;;  %v1178_v51 = vsel %vm1176_vm7, %v1173_v40, %v1175_v44  ;;  %v1177_v54 = vsel %vm1176_vm7, %v1171_v45, %v1173_v40 }
  0xa7   : > { %1903 = vmatmul.mubr.msk.bf16.vlgmr.msra.gmra.mrb[0].mxu0 %vm527_vm2, %v2089_v26  ;;  %1987 = vmatprep.subr.bf16.mxu1 %v2124_v0 }
  0xa8   : > { %847 = vmatpush1.bf16.msra.mxu0 %v838_v33  ;;  %878 = vmatprep.mubr.bf16.mxu0 %v2126_v1 }
  0xa9   : > { %959 = vmatprep.subr.bf16.mxu0 %v952_v35  ;;  %v1286_v46 = vpop.permute.xlu0 %1285  ;;  %v1288_v48 = vpop.permute.xlu1 %1287 }
  0xaa   : > { %v1291_v56 = vsel %vm1289_vm8, %v1286_v46, %v1288_v48 }
  0xad   : > { %1984 = vmatmul.mubr.msk.bf16.vlgmr.msra.gmra.mrb[16].mxu1 %vm527_vm2, %v2091_v37  ;;  %v1284_v50 = vpop.permute.xlu0 %1283  ;;  %v1399_v58 = vpop.permute.xlu1 %1398 }
  0xae   : > { %1988 = vmatpush3.bf16.msra.mxu1 %v1062_v38  ;;  %1989 = vmatprep.mubr.msk.bf16.mxu1 %vm2125_vm0, %v2124_v0  ;;  %v1290_v57 = vsel %vm1289_vm8, %v1284_v50, %v1286_v46  ;;  %v1533_v50 = vlaneseq }
  0xaf   : > { %1993 = vmatprep.subr.bf16.mxu1 %v2124_v0 }
  0xb1   : > { %v1401_v53 = vpop.permute.xlu0 %1400  ;;  %v1397_v60 = vpop.permute.xlu1 %1396 }
  0xb2   : > { %v1404_v59 = vsel %vm1402_vm9, %v1399_v58, %v1401_v53  ;;  %v1403_v61 = vsel %vm1402_vm9, %v1397_v60, %v1399_v58 }
  0xb3   : > { %1908 = vmatmul.mubr.msk.bf16.vlgmr.msra.gmra.mrb[0].mxu0 %vm527_vm2, %v2090_v31 }
  0xb4   : > { %960 = vmatpush1.bf16.msra.mxu0 %v951_v41  ;;  %991 = vmatprep.mubr.bf16.mxu0 %v2126_v1 }
  0xb5   : > { %1990 = vmatmul.mubr.msk.bf16.vlgmr.msra.gmra.mrb[20].mxu1 %vm527_vm2, %v2092_v42  ;;  %1072 = vmatprep.subr.bf16.mxu0 %v1065_v43 }
  0xb6   : > { %1994 = vmatpush3.bf16.msra.mxu1 %v1175_v44  ;;  %1995 = vmatprep.mubr.msk.bf16.mxu1 %vm2125_vm0, %v2124_v0 }
  0xb7   : > { %1999 = vmatprep.subr.bf16.mxu1 %v2124_v0 }
  0xbd   : > { %1996 = vmatmul.mubr.msk.bf16.vlgmr.msra.gmra.mrb[24].mxu1 %vm527_vm2, %v2093_v47 }
  0xbe   : > { %2000 = vmatpush3.bf16.msra.mxu1 %v1288_v48  ;;  %2001 = vmatprep.mubr.msk.bf16.mxu1 %vm2125_vm0, %v2124_v0 }
  0xbf   : > { %1913 = vmatmul.mubr.msk.bf16.vlgmr.msra.gmra.mrb[0].mxu0 %vm527_vm2, %v2091_v37  ;;  %2005 = vmatprep.subr.bf16.mxu1 %v2124_v0 }
  0xc0   : > { %1073 = vmatpush1.bf16.msra.mxu0 %v1064_v49  ;;  %1104 = vmatprep.mubr.bf16.mxu0 %v2126_v1 }
  0xc1   : > { %1185 = vmatprep.subr.bf16.mxu0 %v1178_v51  ;;  %v1534_v51 = vshrl.u32 %v1533_v50, 7 }
  0xc3   : > { %v1535_v60 = vsub.s32 0, %v1534_v51 }
  0xc5   : > { %2002 = vmatmul.mubr.msk.bf16.vlgmr.msra.gmra.mrb[28].mxu1 %vm527_vm2, %v2094_v52 }
  0xc6   : > { %2006 = vmatpush3.bf16.msra.mxu1 %v1401_v53  ;;  %2007 = vmatprep.mubr.msk.bf16.mxu1 %vm2125_vm0, %v2124_v0  ;;  %v1506_v53 = vpop.permute.xlu0 %1505  ;;  %vm1601_vm0 = vcmask 261120  }
  0xca   : > { %v1530_v58 = vpop.permute.xlu0 %1529 }
  0xcb   : > { %1918 = vmatmul.mubr.msk.bf16.vlgmr.msra.gmra.mrb[0].mxu0 %vm527_vm2, %v2092_v42 }
  0xcc   : > { %1186 = vmatpush1.bf16.msra.mxu0 %v1177_v54  ;;  %1217 = vmatprep.mubr.bf16.mxu0 %v2126_v1  ;;  %v1543_v54 = vsub.s32 2, %v1534_v51 }
  0xcd   : > { %2008 = vmatmul.mubr.msk.bf16.vlgmr.msra.gmra.mrb[32].mxu1 %vm527_vm2, %v2095_v55  ;;  %1298 = vmatprep.subr.bf16.mxu0 %v1291_v56 }
  0xd7   : > { %1923 = vmatmul.mubr.msk.bf16.vlgmr.msra.gmra.mrb[0].mxu0 %vm527_vm2, %v2093_v47 }
  0xd8   : > { %1299 = vmatpush1.bf16.msra.mxu0 %v1290_v57  ;;  %1330 = vmatprep.mubr.bf16.mxu0 %v2126_v1 }
  0xd9   : > { %1411 = vmatprep.subr.bf16.mxu0 %v1404_v59 }
  0xe3   : > { %1928 = vmatmul.mubr.msk.bf16.vlgmr.msra.gmra.mrb[0].mxu0 %vm527_vm2, %v2094_v52  ;;  %v1511_v52 = vpop.permute.xlu1 %1510 }
  0xe4   : > { %1412 = vmatpush1.bf16.msra.mxu0 %v1403_v61  ;;  %1443 = vmatprep.mubr.bf16.mxu0 %v2126_v1 }
  0xe7   : > { %v1525_v57 = vpop.permute.xlu1 %1524 }
  0xef   : > { %1933 = vmatmul.mubr.msk.bf16.vlgmr.msra.gmra.mrb[0].mxu0 %vm527_vm2, %v2095_v55  ;;  %v1521_v55 = vld [vmem:[%s454_s19] sm:$0x7] }
  0xf0   : > { %v1544_v56 = vrot.slane %v1521_v55, %v1543_v54 }
  0xf2   : > { %v1550_v61 = vmul.f32 %v1544_v56, %v1525_v57 }
 0x160   : > { %v608_v62 = vpop.f32.mrb[0].mxu1 }
 0x161   : > { %v1961_v63 = vpop.f32.mrb[1].mxu1 }
 0x162   : > { %v611_v0 = vpop.f32.mrb[2].mxu1  ;;  %v1553_v63 = vmul.f32 %v1544_v56, %v1530_v58 }
 0x163   : > { %v1962_v2 = vpop.f32.mrb[3].mxu1 }
 0x164   : > { %v1536_v2 = vrot.slane %v1521_v55, %v1535_v60 }
 0x168   : > { %v703_v3 = vpop.f32.mrb[4].mxu1 }
 0x169   : > { %v704_v4 = vadd.f32 %v703_v3, %v608_v62  ;;  %v1967_v5 = vpop.f32.mrb[5].mxu1 }
 0x16a   : > { %v706_v6 = vpop.f32.mrb[6].mxu1 }
 0x16b   : > { %v707_v7 = vadd.f32 %v706_v6, %v611_v0  ;;  %v1968_v8 = vpop.f32.mrb[7].mxu1  ;;  %v1539_v0 = vsub.s32 1, %v1534_v51  ;;  %v1548_v6 = vmul.f32 %v1536_v2, %v1525_v57 }
 0x16d   : > { %v1540_v5 = vrot.slane %v1521_v55, %v1539_v0 }
 0x170   : > { %v810_v9 = vpop.f32.mrb[8].mxu1 }
 0x171   : > { %v819_v10 = vadd.f32 %v810_v9, %v704_v4  ;;  %v1973_v11 = vpop.f32.mrb[9].mxu1 }
 0x172   : > { %v813_v12 = vpop.f32.mrb[10].mxu1 }
 0x173   : > { %v822_v13 = vadd.f32 %v813_v12, %v707_v7  ;;  %v1974_v14 = vpop.f32.mrb[11].mxu1  ;;  %v487_v7 = vld [vmem:[%s2402_s7] sm:$0x7] }
 0x174   : > { %v1551_v14 = vmul.f32 %v1536_v2, %v1530_v58 }
 0x178   : > { %v923_v15 = vpop.f32.mrb[12].mxu1 }
 0x179   : > { %v932_v1 = vadd.f32 %v923_v15, %v819_v10  ;;  %v1979_v16 = vpop.f32.mrb[13].mxu1 }
 0x17a   : > { %v926_v17 = vpop.f32.mrb[14].mxu1  ;;  %v1590_v16 = vrot.slane %v487_v7, %v1543_v54 }
 0x17b   : > { %v935_v18 = vadd.f32 %v926_v17, %v822_v13  ;;  %v1980_v19 = vpop.f32.mrb[15].mxu1  ;;  %v1549_v13 = vmul.f32 %v1540_v5, %v1525_v57  ;;  %v1552_v17 = vmul.f32 %v1540_v5, %v1530_v58 }
 0x180   : > { %v1036_v20 = vpop.f32.mrb[16].mxu1 }
 0x181   : > { %v1045_v21 = vadd.f32 %v1036_v20, %v932_v1  ;;  %v1985_v22 = vpop.f32.mrb[17].mxu1 }
 0x182   : > { %v1039_v23 = vpop.f32.mrb[18].mxu1 }
 0x183   : > { %v1048_v24 = vadd.f32 %v1039_v23, %v935_v18  ;;  %v1986_v25 = vpop.f32.mrb[19].mxu1 }
 0x188   : > { %v1149_v26 = vpop.f32.mrb[20].mxu1 }
 0x189   : > { %v1158_v27 = vadd.f32 %v1149_v26, %v1045_v21  ;;  %v1991_v28 = vpop.f32.mrb[21].mxu1 }
 0x18a   : > { %v1152_v29 = vpop.f32.mrb[22].mxu1  ;;  %v1586_v28 = vrot.slane %v487_v7, %v1539_v0  ;;  %v1658_v0 = vpop.permute.xlu0 %1657 }
 0x18b   : > { %v1161_v30 = vadd.f32 %v1152_v29, %v1048_v24  ;;  %v1992_v31 = vpop.f32.mrb[23].mxu1  ;;  %v1582_v24 = vrot.slane %v487_v7, %v1535_v60 }
 0x190   : > { %v1262_v32 = vpop.f32.mrb[24].mxu1 }
 0x191   : > { %v1271_v33 = vadd.f32 %v1262_v32, %v1158_v27  ;;  %v1997_v34 = vpop.f32.mrb[25].mxu1 }
 0x192   : > { %v1265_v35 = vpop.f32.mrb[26].mxu1 }
 0x193   : > { %v1274_v36 = vadd.f32 %v1265_v35, %v1161_v30  ;;  %v1998_v37 = vpop.f32.mrb[27].mxu1 }
 0x198   : > { %v1375_v38 = vpop.f32.mrb[28].mxu1 }
 0x199   : > { %v1384_v39 = vadd.f32 %v1375_v38, %v1271_v33  ;;  %v2003_v40 = vpop.f32.mrb[29].mxu1 }
 0x19a   : > { %v1378_v41 = vpop.f32.mrb[30].mxu1 }
 0x19b   : > { %v1387_v42 = vadd.f32 %v1378_v41, %v1274_v36  ;;  %v2004_v43 = vpop.f32.mrb[31].mxu1 }
 0x1a0   : > { %v1488_v44 = vpop.f32.mrb[32].mxu1 }
 0x1a1   : > { %v1497_v45 = vadd.f32 %v1488_v44, %v1384_v39  ;;  %v2009_v46 = vpop.f32.mrb[33].mxu1 }
 0x1a2   : > { %v1491_v47 = vpop.f32.mrb[34].mxu1 }
 0x1a3   : > { %v1500_v48 = vadd.f32 %v1491_v47, %v1387_v42  ;;  %v2010_v49 = vpop.f32.mrb[35].mxu1  ;;  %v1515_v59 = vadd.f32 %v1506_v53, %v1497_v45 }
 0x1a5   : > { %v1518_v62 = vadd.f32 %v1511_v52, %v1500_v48  ;;  %v1556_v3 = vadd.f32 %v1550_v61, %v1515_v59  ;;  %v1671_v61 = vld [vmem:[%s473_s24] sm:$0xff] }
 0x1a7   : > { %v1559_v4 = vadd.f32 %v1553_v63, %v1518_v62  ;;  %v1568_v8 = vmul.f32 0.2, %v1556_v3  ;;  %vm1562_vm10 = vcmp.ge.f32.partialorder %v1556_v3, 0.0  ;;  %v1672_v62 = vld [vmem:[%s473_s24 + $0x8] sm:$0xff]  ;;  %v1663_v63 = vpop.permute.xlu1 %1662 }
 0x1a9   : > { %v1571_v10 = vmul.f32 0.2, %v1559_v4  ;;  %vm1565_vm11 = vcmp.ge.f32.partialorder %v1559_v4, 0.0  ;;  %v2355_v21 = vsel %vm1562_vm10, %v1556_v3, %v1568_v8 }
 0x1aa   : > { %v1596_v31 = vmul.f32 %v1590_v16, %v2355_v21 }
 0x1ab   : > { %v2357_v25 = vsel %vm1565_vm11, %v1559_v4, %v1571_v10 }
 0x1ac   : > { %v1599_v34 = vmul.f32 %v1590_v16, %v2357_v25  ;;  %v1602_v46 = vsel %vm1601_vm0, %v1596_v31, 0.0 }
 0x1ae   : > { %v1616_v48 = vmul.f32 %v1599_v34, %v1599_v34 }
 0x1b0   : > { %v1623_v57 = vsel %vm1601_vm0, %v1616_v48, 0.0 }
 0x1c2   : > { %v1445_v9 = vpop.f32.mrb[0].mxu0 }
 0x1c3   : > { %v1513_v11 = vadd.f32 %v1506_v53, %v1445_v9  ;;  %v1447_v12 = vpop.f32.mrb[1].mxu0 }
 0x1c4   : > { %v1514_v15 = vadd.f32 %v1506_v53, %v1447_v12  ;;  %v1449_v1 = vpop.f32.mrb[2].mxu0  ;;  %v1613_v53 = vmul.f32 %v1596_v31, %v1596_v31 }
 0x1c5   : > { %v1554_v18 = vadd.f32 %v1548_v6, %v1513_v11  ;;  %v1516_v19 = vadd.f32 %v1511_v52, %v1449_v1  ;;  %v1451_v20 = vpop.f32.mrb[3].mxu0 }
 0x1c6   : > { %v1555_v22 = vadd.f32 %v1549_v13, %v1514_v15  ;;  %v1517_v23 = vadd.f32 %v1511_v52, %v1451_v20  ;;  %v1607_v52 = vsel %vm1601_vm0, %v1599_v34, 0.0  ;;  %v1618_v59 = vsel %vm1601_vm0, %v1613_v53, 0.0 }
 0x1c7   : > { %vm1560_vm12 = vcmp.ge.f32.partialorder %v1554_v18, 0.0  ;;  %v1566_v26 = vmul.f32 0.2, %v1554_v18  ;;  %v1557_v27 = vadd.f32 %v1551_v14, %v1516_v19 }
 0x1c8   : > { %vm1561_vm13 = vcmp.ge.f32.partialorder %v1555_v22, 0.0  ;;  %v1567_v29 = vmul.f32 0.2, %v1555_v22  ;;  %v1558_v30 = vadd.f32 %v1552_v17, %v1517_v23 }
 0x1c9   : > { %vm1563_vm14 = vcmp.ge.f32.partialorder %v1557_v27, 0.0  ;;  %v1569_v32 = vmul.f32 0.2, %v1557_v27  ;;  %v2360_v33 = vsel %vm1560_vm12, %v1554_v18, %v1566_v26 }
 0x1ca   : > { %vm1564_vm15 = vcmp.ge.f32.partialorder %v1558_v30, 0.0  ;;  %v1570_v35 = vmul.f32 0.2, %v1558_v30  ;;  %v2363_v36 = vsel %vm1561_vm13, %v1555_v22, %v1567_v29  ;;  %v1594_v37 = vmul.f32 %v1582_v24, %v2360_v33 }
 0x1cb   : > { %v1595_v38 = vmul.f32 %v1586_v28, %v2363_v36  ;;  %v1575_v39 = vsel %vm1563_vm14, %v1557_v27, %v1569_v32 }
 0x1cc   : > { %v1576_v40 = vsel %vm1564_vm15, %v1558_v30, %v1570_v35  ;;  %v1597_v41 = vmul.f32 %v1582_v24, %v1575_v39  ;;  %v1611_v44 = vmul.f32 %v1594_v37, %v1594_v37 }
 0x1cd   : > { %v1600_v42 = vadd.f32 %v1595_v38, %v1594_v37  ;;  %v1598_v43 = vmul.f32 %v1586_v28, %v1576_v40  ;;  %v1612_v45 = vmul.f32 %v1595_v38, %v1595_v38 }
 0x1ce   : > { %v1614_v47 = vmul.f32 %v1597_v41, %v1597_v41 }
 0x1cf   : > { %v1603_v49 = vadd.f32 %v1602_v46, %v1600_v42  ;;  %v1606_v50 = vadd.f32 %v1598_v43, %v1597_v41  ;;  %v1615_v51 = vmul.f32 %v1598_v43, %v1598_v43  ;;  %v1617_v56 = vadd.f32 %v1612_v45, %v1611_v44 }
 0x1d1   : > { %1604 = vadd.xlane.f32.xlu1 %v1603_v49  ;;  %v1608_v54 = vadd.f32 %v1607_v52, %v1606_v50  ;;  %v1622_v55 = vadd.f32 %v1615_v51, %v1614_v47  ;;  %v1619_v60 = vadd.f32 %v1618_v59, %v1617_v56 }
 0x1d3   : > { %1609 = vadd.xlane.f32.xlu0 %v1608_v54  ;;  %v1624_v58 = vadd.f32 %v1623_v57, %v1622_v55 }
 0x1d5   : > { %1625 = vadd.xlane.f32.xlu1 %v1624_v58 }
 0x1d7   : > { %1620 = vadd.xlane.f32.xlu0 %v1619_v60 }
 0x1e6   : > { %1675 = vperm.xlu1 %2082, %v1671_v61  }
 0x1ed   : > { %1680 = vperm.xlu0 %2081, %v1672_v62  }
 0x25e   : > { %v1605_v2 = vpop.xlane.xlu1 %1604 }
 0x25f   : > { %v1627_v4 = vmul.f32 0.00390625, %v1605_v2 }
 0x260   : > { %v1610_v3 = vpop.xlane.xlu0 %1609 }
 0x261   : > { %v1628_v5 = vmul.f32 0.00390625, %v1610_v3  ;;  %v1631_v12 = vmul.f32 %v1627_v4, %v1627_v4  ;;  %v1635_v19 = vsub.f32 %v2360_v33, %v1627_v4  ;;  %v1636_v20 = vsub.f32 %v2363_v36, %v1627_v4 }
 0x262   : > { %v1626_v6 = vpop.xlane.xlu1 %1625  ;;  %v1637_v22 = vsub.f32 %v2355_v21, %v1627_v4 }
 0x263   : > { %v1632_v7 = vmul.f32 %v1628_v5, %v1628_v5  ;;  %v1630_v8 = vmul.f32 0.00390625, %v1626_v6  ;;  %v1638_v1 = vsub.f32 %v1575_v39, %v1628_v5  ;;  %v1639_v16 = vsub.f32 %v1576_v40, %v1628_v5 }
 0x264   : > { %v1621_v9 = vpop.xlane.xlu0 %1620  ;;  %v1640_v17 = vsub.f32 %v2357_v25, %v1628_v5 }
 0x265   : > { %v1634_v10 = vsub.f32 %v1630_v8, %v1632_v7  ;;  %v1629_v11 = vmul.f32 0.00390625, %v1621_v9 }
 0x266   : > { %v1676_v21 = vpop.permute.xlu1 %1675 }
 0x267   : > { %v1642_v13 = vadd.f32 1e-08, %v1634_v10  ;;  %v1633_v14 = vsub.f32 %v1629_v11, %v1631_v12 }
 0x269   : > { %2096 = vrsqrt.f32 %v1642_v13  ;;  %v1641_v15 = vadd.f32 1e-08, %v1633_v14 }
 0x26b   : > { %2098 = vrsqrt.f32 %v1641_v15 }
 0x26c   : > { %v1681_v25 = vpop.permute.xlu0 %1680 }
 0x273   : > { %v2097_v18 = vpop.eup %2096 }
 0x274   : > { %v1648_v23 = vmul.f32 %v2097_v18, %v1638_v1  ;;  %v1649_v24 = vmul.f32 %v2097_v18, %v1639_v16  ;;  %v1650_v26 = vmul.f32 %v2097_v18, %v1640_v17 }
 0x275   : > { %v2099_v27 = vpop.eup %2098 }
 0x276   : > { %v1645_v28 = vmul.f32 %v2099_v27, %v1635_v19  ;;  %v1646_v29 = vmul.f32 %v2099_v27, %v1636_v20  ;;  %v1647_v30 = vmul.f32 %v2099_v27, %v1637_v22  ;;  %v1668_v31 = vmul.f32 %v1663_v63, %v1648_v23 }
 0x277   : > { %v1669_v32 = vmul.f32 %v1663_v63, %v1649_v24  ;;  %v1670_v34 = vmul.f32 %v1663_v63, %v1650_v26 }
 0x278   : > { %v1665_v33 = vmul.f32 %v1658_v0, %v1645_v28  ;;  %v1666_v35 = vmul.f32 %v1658_v0, %v1646_v29  ;;  %v1667_v36 = vmul.f32 %v1658_v0, %v1647_v30  ;;  %v1686_v37 = vadd.f32 %v1681_v25, %v1668_v31 }
 0x279   : > { %v1687_v38 = vadd.f32 %v1681_v25, %v1669_v32  ;;  %v1688_v39 = vadd.f32 %v1681_v25, %v1670_v34 }
 0x27a   : > { %v1683_v40 = vadd.f32 %v1676_v21, %v1665_v33  ;;  %v1684_v41 = vadd.f32 %v1676_v21, %v1666_v35  ;;  %v1685_v42 = vadd.f32 %v1676_v21, %v1667_v36  ;;  %1692 = vst [vmem:[%s484_s10 + $0x18] sm:$0xff] %v1686_v37 }
 0x27b   : > { %1693 = vst [vmem:[%s484_s10 + $0x20] sm:$0xff] %v1687_v38  ;;  %1694 = vst.msk [vmem:[%s484_s10 + $0x28] sm:$0xff] %vm1601_vm0, %v1688_v39 }
 0x27c   : > { %1689 = vst [vmem:[%s484_s10] sm:$0xff] %v1683_v40  ;;  %1690 = vst [vmem:[%s484_s10 + $0x8] sm:$0xff] %v1684_v41 }
 0x27d   : > { %1691 = vst.msk [vmem:[%s484_s10 + $0x10] sm:$0xff] %vm1601_vm0, %v1685_v42 }
 0x27e PF: > { %s18_s29 = sadd.s32 1, %s2122_s29   ;;  %s2404_s27 = smov %s2118_s28 }
 0x27f   : > { %p15_p5 = scmp.ge.s32.totalorder %s18_s29, 4   ;;  %s2405_s28 = smov %s2407_s30 }
 0x281   :  { %17 = sbr.rel (!%p15_p5) target bundleno = 2 (0x2), region = 108 }

// kernel: synthesis_block_forward.2
= control target key start
LH: loop header
LB: loop body
LE: loop exit
PB: predicated region body
PF: predicated region fallthrough
CT: control target
= control target key end

     0   :  { %s2545_s27 = smov 0   ;;  %s2547_s28 = smov 0   ;;  %s2899_s0 = inlined_call_operand.vmem [shape: bf16[2,8,342], index: 0, kind: input, shape index: {}]   ;;  %s2900_s1 = inlined_call_operand.vmem [shape: bf16[9,16,8], index: 1, kind: input, shape index: {}]   ;;  %s2901_s2 = inlined_call_operand.vmem [shape: f32[16,1], index: 2, kind: input, shape index: {}]   ;;  %s2902_s3 = inlined_call_operand.vmem [shape: f32[16,1], index: 3, kind: input, shape index: {}]   ;;  %s2903_s4 = inlined_call_operand.vmem [shape: f32[2,1,288], index: 4, kind: input, shape index: {}]   ;;  %s2904_s5 = inlined_call_operand.vmem [shape: f32[2,16,1], index: 5, kind: input, shape index: {}]   ;;  %s2905_s6 = inlined_call_operand.vmem [shape: f32[2,16,1], index: 6, kind: input, shape index: {}]   ;;  %s2906_s7 = inlined_call_operand.vmem [shape: f32[1,288], index: 7, kind: input, shape index: {}]   ;;  %s2907_s8 = inlined_call_operand.vmem [shape: bf16[2,16,326], index: 8, kind: output, shape index: {}]  }
   0x1   :  { %s2549_s29 = smov 0  }
   0x2 LB: > { %s30_s30 = sadd.s32 1, %s2482_s28  ;;  %p2197_p0 = scmp.ge.s32.totalorder %s2486_s29, 1  ;;  %s2486_s29 = sphi %s2549_s29, %s18_s29   ;;  %s2482_s28 = sphi %s2547_s28, %s2909_s28   ;;  %s2478_s27 = sphi %s2545_s27, %s2908_s27  }
   0x3   : > { %p32_p1 = scmp.ge.s32.totalorder %s30_s30, 2  ;;  %p352_p2 = scmp.lt.s32.totalorder %s2486_s29, 3 }
   0x5   : > { %s2911_s30 = smov (%p32_p1, %s30_s30), 0  ;;  %p353_p3 = pnand %p2197_p0, %p352_p2 }
   0x6   : > { %p428_p4 = scmp.lt.s32.totalorder (!%p353_p3), %s2478_s27, 1  ;;  %v2488_v0 = vmov (!%p353_p3), 0.0   ;;  %vm2489_vm0 = vmmov (!%p353_p3), 0   ;;  %v2490_v1 = vmov (!%p353_p3), 0   ;;  %s2491_s13 = smov (!%p353_p3), 127   ;;  %vm521_vm1 = vcmask (!%p353_p3), 1043456  }
   0x7   : > { %356 = sbr.rel (%p353_p3) target bundleno = 1168 (0x490), region = 52  ;;  %2289 = vmatprep.subr.bf16.mxu1 (!%p353_p3), %v2488_v0  ;;  %2291 = vmatprep.mubr.msk.bf16.mxu1 (!%p353_p3), %vm2489_vm0, %v2488_v0  ;;  %s2492_s14 = smov (!%p353_p3), 126   ;;  %v2451_v9 = vld [vmem:[%s2900_s1 + $0x8] sm:$0xff] (!%p353_p3)   ;;  %vm517_vm2 = vcmask (!%p353_p3), 64512   ;;  %vm514_vm3 = vcmask (!%p353_p3), 1039360   ;;  %vm730_vm4 = vcmask (!%p353_p3), 1031168  }
   0x8   : > { %563 = vmatprep.mubr.bf16.mxu0 (!%p353_p3), %v2490_v1  ;;  %2447 = vset.pattern.permute.xlu1 (!%p353_p3), %v2490_v1  ;;  %s2493_s15 = smov (!%p353_p3), 110   ;;  %s2494_s16 = smov (!%p353_p3), 109   ;;  %v2452_v20 = vld [vmem:[%s2900_s1] sm:$0xff] (!%p353_p3)   ;;  %vm849_vm5 = vcmask (!%p353_p3), 900096   ;;  %v2453_v28 = vld [vmem:[%s2900_s1 + $0x10] sm:$0xff] (!%p353_p3)   ;;  %vm968_vm6 = vcmask (!%p353_p3), 891904  }
   0x9   : > { %2446 = vset.pattern.permute.xlu0 (!%p353_p3), %v2490_v1  ;;  %s2495_s17 = smov (!%p353_p3), 108   ;;  %s2496_s18 = smov (!%p353_p3), 92   ;;  %v2454_v36 = vld [vmem:[%s2900_s1 + $0x18] sm:$0xff] (!%p353_p3)   ;;  %vm1087_vm7 = vcmask (!%p353_p3), 883712   ;;  %v2455_v44 = vld [vmem:[%s2900_s1 + $0x20] sm:$0xff] (!%p353_p3)   ;;  %vm1206_vm8 = vcmask (!%p353_p3), 752640  }
   0xa   : > { %s2497_s19 = smov (!%p353_p3), 91   ;;  %s2498_s20 = smov (!%p353_p3), 90   ;;  %v2456_v52 = vld [vmem:[%s2900_s1 + $0x28] sm:$0xff] (!%p353_p3)   ;;  %vm1325_vm9 = vcmask (!%p353_p3), 744448   ;;  %v2457_v60 = vld [vmem:[%s2900_s1 + $0x30] sm:$0xff] (!%p353_p3)   ;;  %vm1444_vm10 = vcmask (!%p353_p3), 736256  }
   0xb   : > { %vm1571_vm11 = vcmask (!%p353_p3), 154624   ;;  %vm1605_vm12 = vcmask (!%p353_p3), 416768   ;;  %vm1602_vm13 = vcmask (!%p353_p3), 1047704   ;;  %vm1610_vm14 = vcmask (!%p353_p3), 572824  }
   0xc   : > { %1572 = vst.msk [vmem:[#allocation2] sm:$0xff] (!%p353_p3), %vm1571_vm11, %v2488_v0  ;;  %1573 = vst.msk [vmem:[#allocation2 + $0x18] sm:$0xff] (!%p353_p3), %vm1571_vm11, %v2488_v0 }
   0xe   : > { %s2913_s27 = smov (!%p428_p4, %s2478_s27), 1 }
   0xf   : > { %s2407_s9 = smul.u32 12, %s2913_s27 }
  0x11   : > { %s432_s12 = scalar_lea.vmem %s2899_s0, %s2407_s9  ;;  %s2499_s9 = smov 19  }
  0x12   : > { %v2448_v2 = vld [vmem:[%s432_s12 + $0x8] ss:$0 sps:$4 sm:$0xff]   ;;  %v490_v3 = vld [vmem:[%s432_s12] sm:$0xff]  ;;  %s2409_s12 = smul.u32 24, %s2913_s27 }
  0x13   : > { %v2207_v4 = vcombine.low %v490_v3, %v490_v3  ;;  %512 = vrot.lane.b32.xlu1 %v2448_v2, %s2491_s13  ;;  %v2208_v5 = vcombine.high %v490_v3, %v490_v3  ;;  %v630_v10 = vsel %vm521_vm1, %v2448_v2, 0 }
  0x15   : > { %508 = vrot.lane.b32.xlu0 %v2207_v4, %s2491_s13  ;;  %v624_v17 = vsel %vm521_vm1, %v2207_v4, 0 }
  0x17   : > { %724 = vrot.lane.b32.xlu1 %v2207_v4, %s2492_s14 }
  0x19   : > { %510 = vrot.lane.b32.xlu0 %v2208_v5, %s2491_s13 }
  0x1b   : > { %728 = vrot.lane.b32.xlu1 %v2448_v2, %s2492_s14 }
  0x1d   : > { %726 = vrot.lane.b32.xlu0 %v2208_v5, %s2492_s14 }
  0x1f   : > { %845 = vrot.lane.b32.xlu1 %v2208_v5, %s2493_s15 }
  0x21   : > { %843 = vrot.lane.b32.xlu0 %v2207_v4, %s2493_s15 }
  0x23   : > { %962 = vrot.lane.b32.xlu1 %v2207_v4, %s2494_s16 }
  0x25   : > { %847 = vrot.lane.b32.xlu0 %v2448_v2, %s2493_s15 }
  0x27   : > { %966 = vrot.lane.b32.xlu1 %v2448_v2, %s2494_s16 }
  0x29   : > { %964 = vrot.lane.b32.xlu0 %v2208_v5, %s2494_s16 }
  0x2b   : > { %1083 = vrot.lane.b32.xlu1 %v2208_v5, %s2495_s17 }
  0x2d   : > { %1081 = vrot.lane.b32.xlu0 %v2207_v4, %s2495_s17 }
  0x2f   : > { %1200 = vrot.lane.b32.xlu1 %v2207_v4, %s2496_s18 }
  0x31   : > { %1085 = vrot.lane.b32.xlu0 %v2448_v2, %s2495_s17 }
  0x33   : > { %1204 = vrot.lane.b32.xlu1 %v2448_v2, %s2496_s18 }
  0x35   : > { %1202 = vrot.lane.b32.xlu0 %v2208_v5, %s2496_s18 }
  0x37   : > { %1321 = vrot.lane.b32.xlu1 %v2208_v5, %s2497_s19 }
  0x39   : > { %1319 = vrot.lane.b32.xlu0 %v2207_v4, %s2497_s19 }
  0x3b   : > { %1438 = vrot.lane.b32.xlu1 %v2207_v4, %s2498_s20 }
  0x3d   : > { %1323 = vrot.lane.b32.xlu0 %v2448_v2, %s2497_s19  ;;  %s2858_s19 = scalar_lea.vmem %s2907_s8, %s2409_s12 }
  0x3f   : > { %1442 = vrot.lane.b32.xlu1 %v2448_v2, %s2498_s20 }
  0x41   : > { %1440 = vrot.lane.b32.xlu0 %v2208_v5, %s2498_s20 }
  0x85   : > { %v513_v6 = vpop.permute.xlu1 %512 }
  0x86   : > { %v529_v8 = vsel %vm521_vm1, %v513_v6, 0 }
  0x87   : > { %v509_v7 = vpop.permute.xlu0 %508  ;;  %2290 = vmatpush3.bf16.msra.mxu1 %v529_v8 }
  0x88   : > { %2295 = vmatprep.subr.bf16.mxu1 %v2488_v0 }
  0x89   : > { %v725_v11 = vpop.permute.xlu1 %724 }
  0x8a   : > { %2292 = vmatmul.mubr.msk.bf16.vlgmr.msra.gmra.mrb[0].mxu1 %vm517_vm2, %v2451_v9 }
  0x8b   : > { %v511_v12 = vpop.permute.xlu0 %510  ;;  %2296 = vmatpush3.bf16.msra.mxu1 %v630_v10  ;;  %2297 = vmatprep.mubr.msk.bf16.mxu1 %vm2489_vm0, %v2488_v0  ;;  %v2459_v10 = vld [vmem:[%s2900_s1 + $0x40] sm:$0xff]  }
  0x8c   : > { %v516_v13 = vsel %vm514_vm3, %v511_v12, %v513_v6  ;;  %v515_v14 = vsel %vm514_vm3, %v509_v7, %v511_v12  ;;  %2301 = vmatprep.subr.bf16.mxu1 %v2488_v0  ;;  %v2458_v6 = vld [vmem:[%s2900_s1 + $0x38] sm:$0xff]  }
  0x8d   : > { %2210 = vmatprep.subr.msk.bf16.mxu0 %vm521_vm1, %v516_v13  ;;  %v523_v15 = vsel %vm521_vm1, %v515_v14, 0  ;;  %v729_v16 = vpop.permute.xlu1 %728  ;;  %v487_v14 = vld [vmem:[%s2906_s7] sm:$0x7] }
  0x8e   : > { %532 = vmatpush1.bf16.msra.mxu0 %v523_v15  ;;  %v743_v22 = vsel %vm521_vm1, %v729_v16, 0 }
  0x8f   : > { %2214 = vmatprep.subr.msk.bf16.mxu0 %vm521_vm1, %v2208_v5  ;;  %v727_v18 = vpop.permute.xlu0 %726 }
  0x90   : > { %v732_v19 = vsel %vm730_vm4, %v727_v18, %v729_v16  ;;  %v731_v23 = vsel %vm730_vm4, %v725_v11, %v727_v18  ;;  %v1550_v11 = vlaneseq }
  0x91   : > { %2211 = vmatmul.mubr.msk.bf16.vlgmr.msra.gmra.mrb[0].mxu0 %vm517_vm2, %v2451_v9  ;;  %v846_v24 = vpop.permute.xlu1 %845  ;;  %v737_v26 = vsel %vm521_vm1, %v731_v23, 0 }
  0x92   : > { %633 = vmatpush1.bf16.msra.mxu0 %v624_v17  ;;  %664 = vmatprep.mubr.bf16.mxu0 %v2490_v1  ;;  %v2699_v12 = vshrl.u32 %v1550_v11, 7 }
  0x93   : > { %2220 = vmatprep.subr.msk.bf16.mxu0 %vm521_vm1, %v732_v19  ;;  %v844_v21 = vpop.permute.xlu0 %843 }
  0x94   : > { %v850_v31 = vsel %vm849_vm5, %v844_v21, %v846_v24  ;;  %v1560_v13 = vsub.s32 2, %v2699_v12  ;;  %v1556_v17 = vsub.s32 1, %v2699_v12 }
  0x95   : > { %v963_v29 = vpop.permute.xlu1 %962  ;;  %v856_v34 = vsel %vm521_vm1, %v850_v31, 0 }
  0x96   : > { %2298 = vmatmul.mubr.msk.bf16.vlgmr.msra.gmra.mrb[0].mxu1 %vm517_vm2, %v2452_v20  ;;  %v2711_v15 = vrot.slane %v487_v14, %v1560_v13  ;;  %v2719_v23 = vrot.slane %v487_v14, %v1556_v17 }
  0x97   : > { %2302 = vmatpush3.bf16.msra.mxu1 %v743_v22  ;;  %2303 = vmatprep.mubr.msk.bf16.mxu1 %vm2489_vm0, %v2488_v0  ;;  %v848_v25 = vpop.permute.xlu0 %847  ;;  %v1552_v22 = vsub.s32 0, %v2699_v12 }
  0x98   : > { %2307 = vmatprep.subr.bf16.mxu1 %v2488_v0  ;;  %v851_v27 = vsel %vm849_vm5, %v846_v24, %v848_v25  ;;  %v862_v30 = vsel %vm521_vm1, %v848_v25, 0 }
  0x99   : > { %v967_v33 = vpop.permute.xlu1 %966 }
  0x9a   : > { %v981_v38 = vsel %vm521_vm1, %v967_v33, 0 }
  0x9b   : > { %v965_v32 = vpop.permute.xlu0 %964 }
  0x9c   : > { %v970_v35 = vsel %vm968_vm6, %v965_v32, %v967_v33  ;;  %v969_v39 = vsel %vm968_vm6, %v963_v29, %v965_v32  ;;  %vm1961_vm6 = vcmask 150528  }
  0x9d   : > { %2215 = vmatmul.mubr.msk.bf16.vlgmr.msra.gmra.mrb[0].mxu0 %vm517_vm2, %v2452_v20  ;;  %v1084_v40 = vpop.permute.xlu1 %1083  ;;  %v975_v42 = vsel %vm521_vm1, %v969_v39, 0  ;;  %1963 = vst.msk [vmem:[%s2858_s19 + $0xc] sm:$0xf] %vm1961_vm6, %v2490_v1  ;;  %1962 = vst.msk [vmem:[%s2858_s19] sm:$0xf] %vm1961_vm6, %v2490_v1 }
  0x9e   : > { %746 = vmatpush1.bf16.msra.mxu0 %v737_v26  ;;  %777 = vmatprep.mubr.bf16.mxu0 %v2490_v1  ;;  %v2724_v26 = vrot.slane %v487_v14, %v1552_v22 }
  0x9f   : > { %2226 = vmatprep.subr.msk.bf16.mxu0 %vm521_vm1, %v851_v27  ;;  %v1082_v37 = vpop.permute.xlu0 %1081 }
  0xa0   : > { %v1088_v47 = vsel %vm1087_vm7, %v1082_v37, %v1084_v40 }
  0xa1   : > { %v1201_v45 = vpop.permute.xlu1 %1200  ;;  %v1094_v50 = vsel %vm521_vm1, %v1088_v47, 0 }
  0xa2   : > { %2304 = vmatmul.mubr.msk.bf16.vlgmr.msra.gmra.mrb[0].mxu1 %vm517_vm2, %v2453_v28 }
  0xa3   : > { %2308 = vmatpush3.bf16.msra.mxu1 %v862_v30  ;;  %2309 = vmatprep.mubr.msk.bf16.mxu1 %vm2489_vm0, %v2488_v0  ;;  %v1086_v41 = vpop.permute.xlu0 %1085 }
  0xa4   : > { %2313 = vmatprep.subr.bf16.mxu1 %v2488_v0  ;;  %v1089_v43 = vsel %vm1087_vm7, %v1084_v40, %v1086_v41  ;;  %v1100_v46 = vsel %vm521_vm1, %v1086_v41, 0  ;;  %vm1999_vm7 = vcmask 1043608  }
  0xa5   : > { %v1205_v49 = vpop.permute.xlu1 %1204 }
  0xa6   : > { %v1219_v54 = vsel %vm521_vm1, %v1205_v49, 0 }
  0xa7   : > { %v1203_v48 = vpop.permute.xlu0 %1202 }
  0xa8   : > { %v1208_v51 = vsel %vm1206_vm8, %v1203_v48, %v1205_v49  ;;  %v1207_v55 = vsel %vm1206_vm8, %v1201_v45, %v1203_v48 }
  0xa9   : > { %2221 = vmatmul.mubr.msk.bf16.vlgmr.msra.gmra.mrb[0].mxu0 %vm517_vm2, %v2453_v28  ;;  %v1322_v56 = vpop.permute.xlu1 %1321  ;;  %v1213_v58 = vsel %vm521_vm1, %v1207_v55, 0 }
  0xaa   : > { %865 = vmatpush1.bf16.msra.mxu0 %v856_v34  ;;  %896 = vmatprep.mubr.bf16.mxu0 %v2490_v1 }
  0xab   : > { %2232 = vmatprep.subr.msk.bf16.mxu0 %vm521_vm1, %v970_v35  ;;  %v1320_v53 = vpop.permute.xlu0 %1319 }
  0xac   : > { %v1326_v63 = vsel %vm1325_vm9, %v1320_v53, %v1322_v56 }
  0xad   : > { %v1439_v61 = vpop.permute.xlu1 %1438  ;;  %v1332_v4 = vsel %vm521_vm1, %v1326_v63, 0 }
  0xae   : > { %2310 = vmatmul.mubr.msk.bf16.vlgmr.msra.gmra.mrb[0].mxu1 %vm517_vm2, %v2454_v36 }
  0xaf   : > { %2314 = vmatpush3.bf16.msra.mxu1 %v981_v38  ;;  %2315 = vmatprep.mubr.msk.bf16.mxu1 %vm2489_vm0, %v2488_v0  ;;  %v1324_v57 = vpop.permute.xlu0 %1323 }
  0xb0   : > { %2319 = vmatprep.subr.bf16.mxu1 %v2488_v0  ;;  %v1327_v59 = vsel %vm1325_vm9, %v1322_v56, %v1324_v57  ;;  %v1338_v62 = vsel %vm521_vm1, %v1324_v57, 0 }
  0xb1   : > { %v1443_v3 = vpop.permute.xlu1 %1442 }
  0xb2   : > { %v1457_v7 = vsel %vm521_vm1, %v1443_v3, 0 }
  0xb3   : > { %v1441_v2 = vpop.permute.xlu0 %1440 }
  0xb4   : > { %v1446_v5 = vsel %vm1444_vm10, %v1441_v2, %v1443_v3  ;;  %v1445_v8 = vsel %vm1444_vm10, %v1439_v61, %v1441_v2  ;;  %v1783_v61 = vld [vmem:[%s2901_s2] sm:$0xff]  ;;  %vm2003_vm10 = vcmask 412672  }
  0xb5   : > { %2227 = vmatmul.mubr.msk.bf16.vlgmr.msra.gmra.mrb[0].mxu0 %vm517_vm2, %v2454_v36  ;;  %v1451_v9 = vsel %vm521_vm1, %v1445_v8, 0 }
  0xb6   : > { %984 = vmatpush1.bf16.msra.mxu0 %v975_v42  ;;  %1015 = vmatprep.mubr.bf16.mxu0 %v2490_v1 }
  0xb7   : > { %2238 = vmatprep.subr.msk.bf16.mxu0 %vm521_vm1, %v1089_v43 }
  0xba   : > { %2316 = vmatmul.mubr.msk.bf16.vlgmr.msra.gmra.mrb[0].mxu1 %vm517_vm2, %v2455_v44 }
  0xbb   : > { %2320 = vmatpush3.bf16.msra.mxu1 %v1100_v46  ;;  %2321 = vmatprep.mubr.msk.bf16.mxu1 %vm2489_vm0, %v2488_v0 }
  0xbc   : > { %2325 = vmatprep.subr.bf16.mxu1 %v2488_v0 }
  0xc1   : > { %2233 = vmatmul.mubr.msk.bf16.vlgmr.msra.gmra.mrb[0].mxu0 %vm517_vm2, %v2455_v44 }
  0xc2   : > { %1103 = vmatpush1.bf16.msra.mxu0 %v1094_v50  ;;  %1134 = vmatprep.mubr.bf16.mxu0 %v2490_v1 }
  0xc3   : > { %2244 = vmatprep.subr.msk.bf16.mxu0 %vm521_vm1, %v1208_v51 }
  0xc6   : > { %2322 = vmatmul.mubr.msk.bf16.vlgmr.msra.gmra.mrb[0].mxu1 %vm517_vm2, %v2456_v52 }
  0xc7   : > { %2326 = vmatpush3.bf16.msra.mxu1 %v1219_v54  ;;  %2327 = vmatprep.mubr.msk.bf16.mxu1 %vm2489_vm0, %v2488_v0 }
  0xc8   : > { %2331 = vmatprep.subr.bf16.mxu1 %v2488_v0 }
  0xcd   : > { %2239 = vmatmul.mubr.msk.bf16.vlgmr.msra.gmra.mrb[0].mxu0 %vm517_vm2, %v2456_v52 }
  0xce   : > { %1222 = vmatpush1.bf16.msra.mxu0 %v1213_v58  ;;  %1253 = vmatprep.mubr.bf16.mxu0 %v2490_v1  ;;  %v1784_v58 = vld [vmem:[%s2901_s2 + $0x8] sm:$0xff] }
  0xcf   : > { %2250 = vmatprep.subr.msk.bf16.mxu0 %vm521_vm1, %v1327_v59 }
  0xd2   : > { %2328 = vmatmul.mubr.msk.bf16.vlgmr.msra.gmra.mrb[0].mxu1 %vm517_vm2, %v2457_v60 }
  0xd3   : > { %2332 = vmatpush3.bf16.msra.mxu1 %v1338_v62  ;;  %2333 = vmatprep.mubr.msk.bf16.mxu1 %vm2489_vm0, %v2488_v0  ;;  %v1802_v62 = vld [vmem:[%s2902_s3 + $0x8] sm:$0xff] }
  0xd4   : > { %2337 = vmatprep.subr.bf16.mxu1 %v2488_v0 }
  0xd9   : > { %2245 = vmatmul.mubr.msk.bf16.vlgmr.msra.gmra.mrb[0].mxu0 %vm517_vm2, %v2457_v60  ;;  %v1801_v60 = vld [vmem:[%s2902_s3] sm:$0xff] }
  0xda   : > { %1341 = vmatpush1.bf16.msra.mxu0 %v1332_v4  ;;  %1372 = vmatprep.mubr.bf16.mxu0 %v2490_v1 }
  0xdb   : > { %2256 = vmatprep.subr.msk.bf16.mxu0 %vm521_vm1, %v1446_v5 }
  0xde   : > { %2334 = vmatmul.mubr.msk.bf16.vlgmr.msra.gmra.mrb[0].mxu1 %vm517_vm2, %v2458_v6 }
  0xdf   : > { %2338 = vmatpush3.bf16.msra.mxu1 %v1457_v7  ;;  %2339 = vmatprep.mubr.msk.bf16.mxu1 %vm2489_vm0, %v2488_v0 }
  0xe5   : > { %2251 = vmatmul.mubr.msk.bf16.vlgmr.msra.gmra.mrb[0].mxu0 %vm517_vm2, %v2458_v6 }
  0xe6   : > { %1460 = vmatpush1.bf16.msra.mxu0 %v1451_v9  ;;  %1491 = vmatprep.mubr.bf16.mxu0 %v2490_v1 }
  0xea   : > { %2340 = vmatmul.mubr.msk.bf16.vlgmr.msra.gmra.mrb[0].mxu1 %vm517_vm2, %v2459_v10 }
  0xf1   : > { %2257 = vmatmul.mubr.msk.bf16.vlgmr.msra.gmra.mrb[0].mxu0 %vm517_vm2, %v2459_v10  ;;  %vm1867_vm2 = vcmask 261120  }
 0x1bd   : > { %v1536_v16 = vpop.f32.mrb[0].mxu1 }
 0x1be   : > { %v1567_v18 = vmul.f32 %v2711_v15, %v1536_v16  ;;  %v2341_v19 = vpop.f32.mrb[1].mxu1 }
 0x1bf   : > { %v1539_v20 = vpop.f32.mrb[2].mxu1 }
 0x1c0   : > { %1584 = vrot.lane.b32.xlu1 %v1567_v18, %s2499_s9  ;;  %v2342_v21 = vpop.f32.mrb[3].mxu1  ;;  %v1570_v24 = vmul.f32 %v2711_v15, %v1539_v20 }
 0x1c4   : > { %v1493_v25 = vpop.f32.mrb[0].mxu0  ;;  %1590 = vrot.lane.b32.xlu1 %v1570_v24, %s2499_s9 }
 0x1c5   : > { %v1495_v27 = vpop.f32.mrb[1].mxu0  ;;  %v1565_v33 = vmul.f32 %v2724_v26, %v1493_v25 }
 0x1c6   : > { %v1566_v28 = vmul.f32 %v2719_v23, %v1495_v27  ;;  %v1497_v29 = vpop.f32.mrb[2].mxu0 }
 0x1c7   : > { %v1568_v30 = vmul.f32 %v2724_v26, %v1497_v29  ;;  %v1499_v31 = vpop.f32.mrb[3].mxu0 }
 0x1c8   : > { %1582 = vrot.lane.b32.xlu0 %v1566_v28, %s2499_s9  ;;  %v1569_v32 = vmul.f32 %v2719_v23, %v1499_v31 }
 0x1c9   : > { %1586 = vrot.lane.b32.xlu1 %v1568_v30, %s2499_s9 }
 0x1cc   : > { %1588 = vrot.lane.b32.xlu0 %v1569_v32, %s2499_s9 }
 0x1d0   : > { %1580 = vrot.lane.b32.xlu0 %v1565_v33, %s2499_s9 }
 0x232   : > { %v1585_v34 = vpop.permute.xlu1 %1584 }
 0x236   : > { %v1591_v35 = vpop.permute.xlu1 %1590 }
 0x23a   : > { %v1583_v36 = vpop.permute.xlu0 %1582 }
 0x23b   : > { %v1593_v37 = vsel %vm1571_vm11, %v1583_v36, %v1585_v34  ;;  %v1587_v38 = vpop.permute.xlu1 %1586 }
 0x23c   : > { %1606 = vst.msk [vmem:[#allocation2 + $0x10] sm:$0xff] %vm1605_vm12, %v1593_v37 }
 0x23d   : > { %1607 = vst.msk [vmem:[#allocation2 + $0x18] sm:$0xff] %vm1602_vm13, %v1587_v38 }
 0x23e   : > { %1611 = vst.msk [vmem:[#allocation2 + $0x10] sm:$0xff] %vm1610_vm14, %v2488_v0  ;;  %v1589_v39 = vpop.permute.xlu0 %1588 }
 0x23f   : > { %v1594_v40 = vsel %vm1571_vm11, %v1587_v38, %v1589_v39  ;;  %v1595_v41 = vsel %vm1571_vm11, %v1589_v39, %v1591_v35 }
 0x240   : > { %1609 = vst.msk [vmem:[#allocation2 + $0x28] sm:$0xff] %vm1605_vm12, %v1595_v41  ;;  %v1629_v57 = vmul.f32 0.5, %v1594_v40  ;;  %v1623_v59 = vmul.f32 0.25, %v1594_v40  ;;  %vm2007_vm12 = vcmask 568728  }
 0x241   : > { %1612 = vst.msk [vmem:[#allocation2 + $0x28] sm:$0xff] %vm1610_vm14, %v2488_v0 }
 0x242   : > { %v1581_v42 = vpop.permute.xlu0 %1580 }
 0x243   : > { %v1592_v43 = vsel %vm1571_vm11, %v1581_v42, %v1583_v36  ;;  %1603 = vst.msk [vmem:[#allocation2] sm:$0xff] %vm1602_vm13, %v1581_v42 }
 0x244   : > { %v1626_v44 = vmul.f32 0.5, %v1592_v43  ;;  %v1616_v45 = vld [vmem:[#allocation2 + $0x18] sm:$0xff]  ;;  %v1620_v49 = vmul.f32 0.25, %v1592_v43 }
 0x245   : > { %v1628_v46 = vmul.f32 0.5, %v1616_v45  ;;  %v1615_v50 = vld [vmem:[#allocation2 + $0x10] sm:$0xff]  ;;  %v1622_v52 = vmul.f32 0.25, %v1616_v45 }
 0x246   : > { %1639 = vrot.lane.b32.xlu1 %v1626_v44, %s2491_s13  ;;  %v1627_v53 = vmul.f32 0.5, %v1615_v50  ;;  %v1621_v55 = vmul.f32 0.25, %v1615_v50 }
 0x248   : > { %v1618_v51 = vld [vmem:[#allocation2 + $0x28] sm:$0xff] }
 0x249   : > { %v1630_v54 = vmul.f32 0.5, %v1618_v51  ;;  %v1624_v56 = vmul.f32 0.25, %v1618_v51 }
 0x24a   : > { %v1613_v47 = vld [vmem:[#allocation2] sm:$0xff]  ;;  %1643 = vrot.lane.b32.xlu1 %v1628_v46, %s2491_s13 }
 0x24b   : > { %v1625_v48 = vmul.f32 0.5, %v1613_v47  ;;  %v1619_v0 = vmul.f32 0.25, %v1613_v47 }
 0x24d   : > { %1637 = vrot.lane.b32.xlu0 %v1625_v48, %s2491_s13 }
 0x24e   : > { %1674 = vrot.lane.b32.xlu1 %v1620_v49, %s2492_s14 }
 0x251   : > { %1672 = vrot.lane.b32.xlu0 %v1619_v0, %s2492_s14 }
 0x252   : > { %1678 = vrot.lane.b32.xlu1 %v1622_v52, %s2492_s14 }
 0x255   : > { %1641 = vrot.lane.b32.xlu0 %v1627_v53, %s2491_s13 }
 0x256   : > { %1647 = vrot.lane.b32.xlu1 %v1630_v54, %s2491_s13 }
 0x259   : > { %1676 = vrot.lane.b32.xlu0 %v1621_v55, %s2492_s14 }
 0x25a   : > { %1682 = vrot.lane.b32.xlu1 %v1624_v56, %s2492_s14 }
 0x25d   : > { %1645 = vrot.lane.b32.xlu0 %v1629_v57, %s2491_s13  ;;  %s2265_s13 = sshll.u32 %s2913_s27, 4 }
 0x25e   : > { %1792 = vperm.xlu1 %2447, %v1784_v58   ;;  %s463_s23 = scalar_lea.vmem %s2904_s5, %s2265_s13  ;;  %s473_s11 = scalar_lea.vmem %s2905_s6, %s2265_s13 }
 0x261   : > { %1680 = vrot.lane.b32.xlu0 %v1623_v59, %s2492_s14 }
 0x262   : > { %1806 = vperm.xlu1 %2447, %v1801_v60  }
 0x265   : > { %1787 = vperm.xlu0 %2446, %v1783_v61  }
 0x269   : > { %1811 = vperm.xlu0 %2446, %v1802_v62  }
 0x2b8   : > { %v1640_v63 = vpop.permute.xlu1 %1639 }
 0x2bc   : > { %v1644_v2 = vpop.permute.xlu1 %1643 }
 0x2bf   : > { %v1638_v3 = vpop.permute.xlu0 %1637 }
 0x2c0   : > { %v1650_v4 = vsel %vm514_vm3, %v1638_v3, %v1640_v63  ;;  %v1675_v5 = vpop.permute.xlu1 %1674 }
 0x2c1   : > { %v1660_v6 = vadd.f32 %v1650_v4, %v1619_v0 }
 0x2c3   : > { %v1673_v7 = vpop.permute.xlu0 %1672 }
 0x2c4   : > { %v1685_v8 = vsel %vm730_vm4, %v1673_v7, %v1675_v5  ;;  %v1679_v11 = vpop.permute.xlu1 %1678 }
 0x2c5   : > { %v1695_v9 = vadd.f32 %v1685_v8, %v1660_v6 }
 0x2c7   : > { %v1642_v10 = vpop.permute.xlu0 %1641  ;;  %v1707_v14 = vmul.f32 0.5, %v1695_v9  ;;  %v1701_v34 = vmul.f32 0.25, %v1695_v9 }
 0x2c8   : > { %v1651_v16 = vsel %vm514_vm3, %v1640_v63, %v1642_v10  ;;  %v1662_v18 = vadd.f32 %v1642_v10, %v1621_v55  ;;  %v1648_v21 = vpop.permute.xlu1 %1647 }
 0x2c9   : > { %1719 = vrot.lane.b32.xlu1 %v1707_v14, %s2493_s15  ;;  %v1661_v19 = vadd.f32 %v1651_v16, %v1620_v49  ;;  %v1665_v36 = vadd.f32 %v1648_v21, %v1624_v56  ;;  %v1918_v49 = vld [vmem:[%s463_s23 + $0x8] sm:$0xff] }
 0x2ca   : > { %v1920_v51 = vadd.f32 1.0, %v1918_v49 }
 0x2cb   : > { %v1677_v20 = vpop.permute.xlu0 %1676 }
 0x2cc   : > { %v1686_v24 = vsel %vm730_vm4, %v1675_v5, %v1677_v20  ;;  %v1697_v25 = vadd.f32 %v1677_v20, %v1662_v18  ;;  %v1683_v33 = vpop.permute.xlu1 %1682 }
 0x2cd   : > { %v1696_v27 = vadd.f32 %v1686_v24, %v1661_v19  ;;  %v1700_v45 = vadd.f32 %v1683_v33, %v1665_v36 }
 0x2ce   : > { %v1709_v28 = vmul.f32 0.5, %v1697_v25  ;;  %v1703_v43 = vmul.f32 0.25, %v1697_v25 }
 0x2cf   : > { %v1646_v29 = vpop.permute.xlu0 %1645  ;;  %v1708_v30 = vmul.f32 0.5, %v1696_v27  ;;  %v1702_v38 = vmul.f32 0.25, %v1696_v27  ;;  %v1712_v48 = vmul.f32 0.5, %v1700_v45  ;;  %v2793_v53 = vmul.f32 0.25, %v1700_v45 }
 0x2d0   : > { %v1652_v31 = vsel %vm514_vm3, %v1644_v2, %v1646_v29  ;;  %1723 = vrot.lane.b32.xlu1 %v1709_v28, %s2493_s15  ;;  %v1653_v32 = vsel %vm514_vm3, %v1646_v29, %v1648_v21 }
 0x2d1   : > { %1721 = vrot.lane.b32.xlu0 %v1708_v30, %s2493_s15  ;;  %v1663_v35 = vadd.f32 %v1652_v31, %v1622_v52  ;;  %v1664_v39 = vadd.f32 %v1653_v32, %v1623_v59  ;;  %v1917_v52 = vld [vmem:[%s463_s23] sm:$0xff] }
 0x2d2   : > { %v1919_v54 = vadd.f32 1.0, %v1917_v52 }
 0x2d3   : > { %v1681_v37 = vpop.permute.xlu0 %1680 }
 0x2d4   : > { %v1687_v40 = vsel %vm730_vm4, %v1679_v11, %v1681_v37  ;;  %v1688_v41 = vsel %vm730_vm4, %v1681_v37, %v1683_v33  ;;  %1754 = vrot.lane.b32.xlu1 %v1701_v34, %s2496_s18 }
 0x2d5   : > { %v1698_v42 = vadd.f32 %v1687_v40, %v1663_v35  ;;  %1756 = vrot.lane.b32.xlu0 %v1702_v38, %s2496_s18  ;;  %v1699_v44 = vadd.f32 %v1688_v41, %v1664_v39 }
 0x2d7   : > { %v1710_v46 = vmul.f32 0.5, %v1698_v42  ;;  %v1711_v47 = vmul.f32 0.5, %v1699_v44  ;;  %v2788_v50 = vmul.f32 0.25, %v1699_v44  ;;  %v1704_v0 = vmul.f32 0.25, %v1698_v42 }
 0x2d8   : > { %1758 = vrot.lane.b32.xlu1 %v1703_v43, %s2496_s18 }
 0x2d9   : > { %1725 = vrot.lane.b32.xlu0 %v1710_v46, %s2493_s15 }
 0x2dc   : > { %1727 = vrot.lane.b32.xlu1 %v1711_v47, %s2493_s15 }
 0x2dd   : > { %1729 = vrot.lane.b32.xlu0 %v1712_v48, %s2493_s15  ;;  %v2797_v55 = vpop.permute.xlu1 %1792  ;;  %s2408_s15 = smul.u32 3, %s2913_s27 }
 0x2df   : > { %s454_s26 = scalar_lea.vmem %s2903_s4, %s2408_s15 }
 0x2e0   : > { %1762 = vrot.lane.b32.xlu1 %v2788_v50, %s2496_s18  ;;  %v1803_v62 = vld [vmem:[%s454_s26] sm:$0x7] }
 0x2e1   : > { %1760 = vrot.lane.b32.xlu0 %v1704_v0, %s2496_s18  ;;  %v1807_v56 = vpop.permute.xlu1 %1806  ;;  %v1818_v3 = vrot.slane %v1803_v62, %v1552_v22  ;;  %v1826_v8 = vrot.slane %v1803_v62, %v1560_v13  ;;  %v1822_v11 = vrot.slane %v1803_v62, %v1556_v17 }
 0x2e3   : > { %v1830_v18 = vmul.f32 %v1818_v3, %v1807_v56  ;;  %v1832_v25 = vmul.f32 %v1826_v8, %v1807_v56  ;;  %v1831_v29 = vmul.f32 %v1822_v11, %v1807_v56 }
 0x2e4   : > { %1928 = vperm.xlu1 %2447, %v1920_v51   ;;  %v1788_v57 = vpop.permute.xlu0 %1787 }
 0x2e5   : > { %1764 = vrot.lane.b32.xlu0 %v2793_v53, %s2496_s18 }
 0x2e8   : > { %v2800_v59 = vpop.permute.xlu0 %1811 }
 0x2e9   : > { %1923 = vperm.xlu0 %2446, %v1919_v54   ;;  %v1833_v49 = vmul.f32 %v1818_v3, %v2800_v59 }
 0x33b   : > { %v1720_v58 = vpop.permute.xlu1 %1719 }
 0x342   : > { %v1724_v60 = vpop.permute.xlu1 %1723 }
 0x343   : > { %v1722_v61 = vpop.permute.xlu0 %1721  ;;  %v1744_v9 = vadd.f32 %v1724_v60, %v1703_v43 }
 0x344   : > { %v1732_v63 = vsel %vm849_vm5, %v1720_v58, %v1722_v61  ;;  %v1733_v5 = vsel %vm849_vm5, %v1722_v61, %v1724_v60 }
 0x345   : > { %v1742_v4 = vadd.f32 %v1732_v63, %v1701_v34  ;;  %v1743_v14 = vadd.f32 %v1733_v5, %v1702_v38  ;;  %v1835_v63 = vmul.f32 %v1826_v8, %v2800_v59 }
 0x346   : > { %v1755_v2 = vpop.permute.xlu1 %1754 }
 0x347   : > { %v1757_v6 = vpop.permute.xlu0 %1756 }
 0x348   : > { %v1767_v7 = vsel %vm1206_vm8, %v1755_v2, %v1757_v6  ;;  %v1834_v2 = vmul.f32 %v1822_v11, %v2800_v59 }
 0x349   : > { %v1777_v10 = vadd.f32 %v1767_v7, %v1742_v4 }
 0x34a   : > { %v1759_v16 = vpop.permute.xlu1 %1758 }
 0x34b   : > { %v1795_v19 = vadd.f32 %v1788_v57, %v1777_v10  ;;  %v1726_v20 = vpop.permute.xlu0 %1725  ;;  %v1768_v22 = vsel %vm1206_vm8, %v1757_v6, %v1759_v16  ;;  %v1779_v21 = vadd.f32 %v1759_v16, %v1744_v9 }
 0x34c   : > { %v1778_v24 = vadd.f32 %v1768_v22, %v1743_v14 }
 0x34d   : > { %v1836_v27 = vadd.f32 %v1830_v18, %v1795_v19  ;;  %v1797_v28 = vadd.f32 %v1788_v57, %v1779_v21 }
 0x34e   : > { %v1796_v30 = vadd.f32 %v1788_v57, %v1778_v24  ;;  %v1728_v13 = vpop.permute.xlu1 %1727 }
 0x34f   : > { %v1838_v31 = vadd.f32 %v1832_v25, %v1797_v28  ;;  %v1730_v32 = vpop.permute.xlu0 %1729  ;;  %vm1842_vm15 = vcmp.ge.f32.partialorder %v1836_v27, 0.0  ;;  %v1848_v12 = vmul.f32 0.2, %v1836_v27  ;;  %v1734_v33 = vsel %vm849_vm5, %v1726_v20, %v1728_v13 }
 0x350   : > { %v1837_v17 = vadd.f32 %v1831_v29, %v1796_v30  ;;  %v1745_v38 = vadd.f32 %v1734_v33, %v1704_v0  ;;  %v1735_v41 = vsel %vm849_vm5, %v1728_v13, %v1730_v32  ;;  %v1747_v48 = vadd.f32 %v1730_v32, %v2793_v53  ;;  %v1937_v32 = vld [vmem:[%s473_s11] sm:$0xff] }
 0x351   : > { %vm1844_vm0 = vcmp.ge.f32.partialorder %v1838_v31, 0.0  ;;  %v1850_v34 = vmul.f32 0.2, %v1838_v31  ;;  %v2816_v37 = vsel %vm1842_vm15, %v1836_v27, %v1848_v12  ;;  %v1746_v0 = vadd.f32 %v1735_v41, %v2788_v50  ;;  %v1938_v12 = vld [vmem:[%s473_s11 + $0x8] sm:$0xff] }
 0x352   : > { %v1763_v35 = vpop.permute.xlu1 %1762  ;;  %vm1843_vm1 = vcmp.ge.f32.partialorder %v1837_v17, 0.0  ;;  %v1849_v36 = vmul.f32 0.2, %v1837_v17  ;;  %v1860_v46 = vmul.f32 %v2816_v37, %v2724_v26 }
 0x353   : > { %v1761_v39 = vpop.permute.xlu0 %1760  ;;  %v2818_v40 = vsel %vm1844_vm0, %v1838_v31, %v1850_v34 }
 0x354   : > { %v1769_v42 = vsel %vm1206_vm8, %v1761_v39, %v1763_v35  ;;  %v2822_v43 = vsel %vm1843_vm1, %v1837_v17, %v1849_v36  ;;  %v1862_v44 = vmul.f32 %v2818_v40, %v2711_v15  ;;  %v1877_v22 = vmul.f32 %v1860_v46, %v1860_v46 }
 0x355   : > { %v1780_v45 = vadd.f32 %v1769_v42, %v1745_v38  ;;  %v1861_v47 = vmul.f32 %v2822_v43, %v2719_v23 }
 0x356   : > { %v1868_v58 = vsel %vm1867_vm2, %v1862_v44, 0.0  ;;  %v1879_v24 = vmul.f32 %v1862_v44, %v1862_v44 }
 0x357   : > { %v1798_v51 = vadd.f32 %v2797_v55, %v1780_v45  ;;  %v1765_v52 = vpop.permute.xlu0 %1764  ;;  %v1866_v54 = vadd.f32 %v1861_v47, %v1860_v46  ;;  %v1878_v11 = vmul.f32 %v1861_v47, %v1861_v47 }
 0x358   : > { %v1770_v56 = vsel %vm1206_vm8, %v1763_v35, %v1765_v52  ;;  %v1782_v57 = vadd.f32 %v1765_v52, %v1747_v48  ;;  %v1884_v13 = vsel %vm1867_vm2, %v1879_v24, 0.0  ;;  %vm2000_vm8 = vcmask 1047556  }
 0x359   : > { %v1839_v60 = vadd.f32 %v1833_v49, %v1798_v51  ;;  %v1781_v61 = vadd.f32 %v1770_v56, %v1746_v0  ;;  %v1869_v62 = vadd.f32 %v1868_v58, %v1866_v54  ;;  %v1883_v28 = vadd.f32 %v1878_v11, %v1877_v22  ;;  %vm2001_vm9 = vmor %vm2000_vm8, %vm1999_vm7 }
 0x35a   : > { %v1800_v53 = vadd.f32 %v2797_v55, %v1782_v57 }
 0x35b   : > { %v1799_v50 = vadd.f32 %v2797_v55, %v1781_v61  ;;  %1870 = vadd.xlane.f32.xlu1 %v1869_v62  ;;  %vm1845_vm3 = vcmp.ge.f32.partialorder %v1839_v60, 0.0  ;;  %v1851_v3 = vmul.f32 0.2, %v1839_v60  ;;  %v1885_v31 = vadd.f32 %v1884_v13, %v1883_v28 }
 0x35c   : > { %v1841_v4 = vadd.f32 %v1835_v63, %v1800_v53 }
 0x35d   : > { %v1840_v5 = vadd.f32 %v1834_v2, %v1799_v50  ;;  %v2840_v6 = vsel %vm1845_vm3, %v1839_v60, %v1851_v3 }
 0x35e   : > { %vm1847_vm4 = vcmp.ge.f32.partialorder %v1841_v4, 0.0  ;;  %v1853_v7 = vmul.f32 0.2, %v1841_v4  ;;  %v1863_v8 = vmul.f32 %v2840_v6, %v2724_v26 }
 0x35f   : > { %vm1846_vm5 = vcmp.ge.f32.partialorder %v1840_v5, 0.0  ;;  %v1852_v9 = vmul.f32 0.2, %v1840_v5 }
 0x360   : > { %v1859_v10 = vsel %vm1847_vm4, %v1841_v4, %v1853_v7  ;;  %v1880_v19 = vmul.f32 %v1863_v8, %v1863_v8 }
 0x361   : > { %v1858_v14 = vsel %vm1846_vm5, %v1840_v5, %v1852_v9  ;;  %v1865_v59 = vmul.f32 %v1859_v10, %v2711_v15 }
 0x362   : > { %v1864_v55 = vmul.f32 %v1858_v14, %v2719_v23 }
 0x363   : > { %v1882_v16 = vmul.f32 %v1865_v59, %v1865_v59  ;;  %v1873_v21 = vsel %vm1867_vm2, %v1865_v59, 0.0  ;;  %v1929_v17 = vpop.permute.xlu1 %1928 }
 0x364   : > { %v1872_v18 = vadd.f32 %v1864_v55, %v1863_v8  ;;  %v1881_v20 = vmul.f32 %v1864_v55, %v1864_v55 }
 0x365   : > { %v1889_v29 = vsel %vm1867_vm2, %v1882_v16, 0.0 }
 0x366   : > { %v1874_v25 = vadd.f32 %v1873_v21, %v1872_v18  ;;  %v1888_v27 = vadd.f32 %v1881_v20, %v1880_v19 }
 0x368   : > { %1875 = vadd.xlane.f32.xlu0 %v1874_v25  ;;  %v1890_v30 = vadd.f32 %v1889_v29, %v1888_v27  ;;  %v1924_v33 = vpop.permute.xlu0 %1923 }
 0x36a   : > { %1891 = vadd.xlane.f32.xlu1 %v1890_v30 }
 0x36c   : > { %1886 = vadd.xlane.f32.xlu0 %v1885_v31 }
 0x37b   : > { %1941 = vperm.xlu1 %2447, %v1937_v32  }
 0x382   : > { %1946 = vperm.xlu0 %2446, %v1938_v12  }
 0x3e8   : > { %v1871_v34 = vpop.xlane.xlu1 %1870 }
 0x3e9   : > { %v1893_v36 = vmul.f32 0.00390625, %v1871_v34 }
 0x3eb   : > { %v1897_v46 = vmul.f32 %v1893_v36, %v1893_v36  ;;  %v1901_v57 = vsub.f32 %v2816_v37, %v1893_v36  ;;  %v1902_v58 = vsub.f32 %v2822_v43, %v1893_v36  ;;  %v1903_v60 = vsub.f32 %v2818_v40, %v1893_v36 }
 0x3f5   : > { %v1876_v35 = vpop.xlane.xlu0 %1875 }
 0x3f6   : > { %v1894_v38 = vmul.f32 0.00390625, %v1876_v35 }
 0x3f7   : > { %v1892_v39 = vpop.xlane.xlu1 %1891 }
 0x3f8   : > { %v1898_v41 = vmul.f32 %v1894_v38, %v1894_v38  ;;  %v1896_v42 = vmul.f32 0.00390625, %v1892_v39  ;;  %v1904_v51 = vsub.f32 %v2840_v6, %v1894_v38  ;;  %v1905_v52 = vsub.f32 %v1858_v14, %v1894_v38 }
 0x3f9   : > { %v1887_v44 = vpop.xlane.xlu0 %1886  ;;  %v1906_v54 = vsub.f32 %v1859_v10, %v1894_v38 }
 0x3fa   : > { %v1895_v45 = vmul.f32 0.00390625, %v1887_v44  ;;  %v1900_v47 = vsub.f32 %v1896_v42, %v1898_v41 }
 0x3fb   : > { %v1942_v14 = vpop.permute.xlu1 %1941 }
 0x3fc   : > { %v1899_v48 = vsub.f32 %v1895_v45, %v1897_v46  ;;  %v1908_v49 = vadd.f32 1e-08, %v1900_v47 }
 0x3fe   : > { %v1907_v0 = vadd.f32 1e-08, %v1899_v48  ;;  %2460 = vrsqrt.f32 %v1908_v49 }
 0x400   : > { %2462 = vrsqrt.f32 %v1907_v0 }
 0x401   : > { %v1947_v8 = vpop.permute.xlu0 %1946 }
 0x408   : > { %v2461_v56 = vpop.eup %2460 }
 0x409   : > { %v1914_v62 = vmul.f32 %v2461_v56, %v1904_v51  ;;  %v1915_v63 = vmul.f32 %v2461_v56, %v1905_v52  ;;  %v1916_v53 = vmul.f32 %v2461_v56, %v1906_v54 }
 0x40a   : > { %v2463_v61 = vpop.eup %2462 }
 0x40b   : > { %v1911_v2 = vmul.f32 %v2463_v61, %v1901_v57  ;;  %v1912_v50 = vmul.f32 %v2463_v61, %v1902_v58  ;;  %v1913_v3 = vmul.f32 %v2463_v61, %v1903_v60  ;;  %v1934_v4 = vmul.f32 %v1929_v17, %v1914_v62 }
 0x40c   : > { %v1935_v5 = vmul.f32 %v1929_v17, %v1915_v63  ;;  %v1936_v7 = vmul.f32 %v1929_v17, %v1916_v53 }
 0x40d   : > { %v1931_v6 = vmul.f32 %v1924_v33, %v1911_v2  ;;  %v1932_v9 = vmul.f32 %v1924_v33, %v1912_v50  ;;  %v1933_v10 = vmul.f32 %v1924_v33, %v1913_v3  ;;  %v1952_v37 = vadd.f32 %v1947_v8, %v1934_v4 }
 0x40e   : > { %v1953_v59 = vadd.f32 %v1947_v8, %v1935_v5  ;;  %v1954_v43 = vadd.f32 %v1947_v8, %v1936_v7 }
 0x40f   : > { %v1949_v55 = vadd.f32 %v1942_v14, %v1931_v6  ;;  %v1950_v40 = vadd.f32 %v1942_v14, %v1932_v9  ;;  %v1951_v11 = vadd.f32 %v1942_v14, %v1933_v10  ;;  %v1958_v16 = vmul.f32 %v1952_v37, %v2724_v26 }
 0x410   : > { %v1959_v18 = vmul.f32 %v1953_v59, %v2719_v23  ;;  %v1960_v21 = vmul.f32 %v1954_v43, %v2711_v15 }
 0x411   : > { %v1955_v19 = vmul.f32 %v1949_v55, %v2724_v26  ;;  %v1956_v20 = vmul.f32 %v1950_v40, %v2719_v23  ;;  %v1957_v25 = vmul.f32 %v1951_v11, %v2711_v15 }
 0x412   : > { %v2269_v22 = vpack.c.bf16 %v1959_v18, %v1958_v16  ;;  %v2270_v27 = vpack.c.bf16 %v1960_v21, %v1960_v21 }
 0x413   : > { %v2267_v24 = vpack.c.bf16 %v1956_v20, %v1955_v19  ;;  %v2268_v28 = vpack.c.bf16 %v1957_v25, %v1957_v25 }
 0x414   : > { %1984 = vrot.lane.b32.xlu0 %v2269_v22, %s2499_s9 }
 0x415   : > { %1980 = vrot.lane.b32.xlu1 %v2267_v24, %s2499_s9 }
 0x418   : > { %1986 = vrot.lane.b32.xlu0 %v2270_v27, %s2499_s9 }
 0x419   : > { %1982 = vrot.lane.b32.xlu1 %v2268_v28, %s2499_s9 }
 0x486   : > { %v1985_v23 = vpop.permute.xlu0 %1984 }
 0x487   : > { %v1989_v15 = vrot.slane %v1985_v23, 4  ;;  %v1981_v26 = vpop.permute.xlu1 %1980 }
 0x488   : > { %v1988_v29 = vrot.slane %v1981_v26, 4 }
 0x489   : > { %v1993_v30 = vsel %vm1571_vm11, %v1989_v15, %v1985_v23 }
 0x48a   : > { %2005 = vst.msk [vmem:[%s2858_s19 + $0xc] sm:$0xff] %vm2001_vm9, %v1993_v30  ;;  %v1991_v13 = vsel %vm1571_vm11, %v1988_v29, %v1981_v26  ;;  %v1987_v31 = vpop.permute.xlu0 %1986 }
 0x48b   : > { %2002 = vst.msk [vmem:[%s2858_s19] sm:$0xff] %vm2001_vm9, %v1991_v13  ;;  %v1994_v32 = vsel %vm1571_vm11, %v1989_v15, %v1987_v31  ;;  %v1983_v12 = vpop.permute.xlu1 %1982 }
 0x48c   : > { %2006 = vst.msk [vmem:[%s2858_s19 + $0x14] sm:$0xf] %vm2003_vm10, %v1994_v32  ;;  %v1992_v17 = vsel %vm1571_vm11, %v1988_v29, %v1983_v12 }
 0x48d   : > { %2009 = vst.msk [vmem:[%s2858_s19 + $0x14] sm:$0xf] %vm2007_vm12, %v2490_v1 }
 0x48e   : > { %2004 = vst.msk [vmem:[%s2858_s19 + $0x8] sm:$0xf] %vm2003_vm10, %v1992_v17 }
 0x48f   : > { %2008 = vst.msk [vmem:[%s2858_s19 + $0x8] sm:$0xf] %vm2007_vm12, %v2490_v1 }
 0x490 PF: > { %s18_s29 = sadd.s32 1, %s2486_s29   ;;  %s2908_s27 = smov %s2482_s28 }
 0x491   : > { %p15_p5 = scmp.ge.s32.totalorder %s18_s29, 4   ;;  %s2909_s28 = smov %s2911_s30 }
 0x493   :  { %17 = sbr.rel (!%p15_p5) target bundleno = 2 (0x2), region = 108 }

</bundles_post_ra>
